<compile_context>
chip_gen: v7x
topology: tpu7x:2x2x1
jax: 0.10.0
libtpu: 0.0.40
codegen_flags: <defaults>
</compile_context>

<pallas_src>
import jax
import jax.numpy as jnp
from jax.experimental import pallas as pl
from jax.experimental.pallas import tpu as pltpu

_BN_EPS = 1e-5


# -----------------------------------------------------------------------------
# Pallas kernel: fused upsample + edge-gated mixing + merged 1x1 conv (+BN fold)
# -----------------------------------------------------------------------------
def _sbg_kernel(s_ref, e_ref, d_ref, uh_ref, uwt_ref, wm_ref, b_ref, o_ref):
    """One (batch, row-tile) grid step.

    s_ref : (1, C, TH, W)    skip rows (full resolution)
    e_ref : (1, 1, TH, W)    edge attention rows
    d_ref : (1, Hh, C*Wh)    whole half-res deep image, channels folded to lanes
    uh_ref: (TH, Hh)         row-interpolation weights for this tile
    uwt_ref:(Wh, W)          column-interpolation weights (transposed)
    wm_ref: (2C, C) SMEM     merged, BN-scaled 1x1-conv weights
    b_ref : (C,)   SMEM      merged BN bias
    o_ref : (1, C, TH, W)    output rows (doubles as the accumulator)
    """
    C = s_ref.shape[1]
    Wh = uwt_ref.shape[0]
    e = e_ref[0, 0]                      # (TH, W)
    one_m_e = 1.0 - e
    uwt = uwt_ref[...]                   # (Wh, W)

    # Fused bilinear (align_corners) upsample, stage 1 batched over channels:
    # a single (TH, Hh) x (Hh, C*Wh) MXU matmul instead of C narrow ones.
    rows_all = jnp.dot(uh_ref[...], d_ref[0],
                       preferred_element_type=jnp.float32)      # (TH, C*Wh)

    for c in range(C):                   # C is small & static -> unrolled
        # Stage 2: (TH, Wh) x (Wh, W); output width W is the lane-dense dim.
        d_up = jnp.dot(rows_all[:, c * Wh:(c + 1) * Wh], uwt,
                       preferred_element_type=jnp.float32)       # (TH, W)
        s_c = s_ref[0, c]                # (TH, W)
        x1 = one_m_e * d_up + s_c        # conv_skip branch input, channel c
        x2 = d_up + e * s_c              # conv_deep branch input, channel c
        # Merged 1x1 convs with folded BN, accumulated directly into the VMEM
        # output block -> no 2C live (TH, W) intermediates, no spills.
        for co in range(C):
            contrib = x1 * wm_ref[c, co] + x2 * wm_ref[C + c, co]
            if c == 0:
                o_ref[0, co, :, :] = b_ref[co] + contrib
            else:
                o_ref[0, co, :, :] = o_ref[0, co, :, :] + contrib


# -----------------------------------------------------------------------------
# Host-side helpers
# -----------------------------------------------------------------------------
def _interp_matrix(out_size, in_size):
    """(out_size, in_size) bilinear interpolation matrix, align_corners=True."""
    if in_size == 1:
        return jnp.ones((out_size, 1), jnp.float32)
    pos = jnp.arange(out_size, dtype=jnp.float32) * (in_size - 1) / (out_size - 1)
    lo = jnp.floor(pos).astype(jnp.int32)
    hi = jnp.minimum(lo + 1, in_size - 1)
    frac = pos - lo.astype(jnp.float32)
    return ((1.0 - frac)[:, None] * jax.nn.one_hot(lo, in_size, dtype=jnp.float32)
            + frac[:, None] * jax.nn.one_hot(hi, in_size, dtype=jnp.float32))


def _vmem_footprint(TH, W, C, Hh, Wh):
    """Honest per-tile VMEM model: resident blocks + in-kernel working set."""
    fixed = 4 * (2 * C * Hh * Wh        # deep block (pipeline double-buffers it)
                 + 2 * Wh * W)          # uwt (double-buffered)
    fixed += 512 * 1024                 # compiler-internal scratch slack
    per_row = 4 * (2 * (2 * C + 1) * W  # skip + out + edge streams, 2 buffers
                   + 2 * Hh             # uh rows, 2 buffers
                   + C * Wh + 8 * W)    # live intermediates (rows_all, d_up, x1, x2, ...)
    return fixed + TH * per_row, per_row, fixed


def _pick_row_tile(H, W, C, Hh, Wh, budget_bytes):
    """Largest 8-aligned row tile whose full footprint fits the budget."""
    _, per_row, fixed = _vmem_footprint(8, W, C, Hh, Wh)
    avail = max(budget_bytes - fixed, 8 * per_row)
    cap_rows = max(avail // per_row, 8)
    if cap_rows >= H:
        return H
    return max(8, int(cap_rows // 8) * 8)


# -----------------------------------------------------------------------------
# Wrapper
# -----------------------------------------------------------------------------
def sbg_forward(skip, deep, edge_att, params, *, row_tile=None,
                vmem_limit_bytes=None):
    """skip: (N,C,H,W), deep: (N,C,Hh,Wh) (typically H/2,W/2), edge_att: (N,1,H,W)."""
    N, C, H, W = skip.shape
    Hh, Wh = deep.shape[2], deep.shape[3]

    skip = skip.astype(jnp.float32)
    edge_att = edge_att.astype(jnp.float32)

    # Fold eval-mode BatchNorm into the 1x1-conv weights, merge both branches
    # into a single (2C, C) weight table and one bias vector.
    ssk = params["g_skip"] / jnp.sqrt(params["v_skip"] + _BN_EPS)
    sdp = params["g_deep"] / jnp.sqrt(params["v_deep"] + _BN_EPS)
    wsk_t = params["w_skip"].reshape(C, C).T * ssk[None, :]   # (Cin, Cout), BN-scaled
    wdp_t = params["w_deep"].reshape(C, C).T * sdp[None, :]
    wm = jnp.concatenate([wsk_t, wdp_t], axis=0).astype(jnp.float32)   # (2C, C)
    bias = ((params["b_skip"] - params["m_skip"] * ssk)
            + (params["b_deep"] - params["m_deep"] * sdp)).astype(jnp.float32)  # (C,)

    # Interpolation matrices for the fused bilinear upsample.
    uh = _interp_matrix(H, Hh)          # (H, Hh)
    uwt = _interp_matrix(W, Wh).T       # (Wh, W)

    # Channel-batched deep layout: (N, Hh, C*Wh) so the row-interp stage is one
    # lane-dense matmul.  Quarter-size transpose done once here in XLA.
    deep_flat = jnp.transpose(deep.astype(jnp.float32),
                              (0, 2, 1, 3)).reshape(N, Hh, C * Wh)

    try:
        vmem_cap = int(pltpu.get_tpu_info().vmem_capacity_bytes)
    except Exception:
        vmem_cap = 64 * 1024 * 1024     # v7x-conservative fallback
    budget = min(int(vmem_cap * 0.7), 96 * 1024 * 1024)

    TH = row_tile if row_tile is not None else _pick_row_tile(H, W, C, Hh, Wh, budget)
    assert TH == H or TH % 8 == 0, "row_tile must be a multiple of 8 (or == H)"

    needed, _, _ = _vmem_footprint(TH, W, C, Hh, Wh)
    if vmem_limit_bytes is None:
        vmem_limit_bytes = int(min(max(2 * needed, 32 * 1024 * 1024),
                                   vmem_cap - 2 * 1024 * 1024))

    # Advisory cost hint for XLA scheduling around the custom call.
    flops = N * (2 * H * Hh * C * Wh            # stage-1 interp matmul
                 + 2 * C * H * W * Wh           # stage-2 interp matmuls
                 + C * H * W * (7 + 4 * C))     # gating + merged conv + bias
    bytes_accessed = 4 * N * (2 * C * H * W + H * W + C * Hh * Wh)

    def row_block(ch):
        return pl.BlockSpec((1, ch, TH, W), lambda n, i: (n, 0, i, 0))

    out = pl.pallas_call(
        _sbg_kernel,
        out_shape=jax.ShapeDtypeStruct((N, C, H, W), jnp.float32),
        grid_spec=pltpu.PrefetchScalarGridSpec(
            num_scalar_prefetch=0,
            grid=(N, pl.cdiv(H, TH)),
            in_specs=[
                row_block(C),                                            # skip rows
                row_block(1),                                            # edge rows
                pl.BlockSpec((1, Hh, C * Wh), lambda n, i: (n, 0, 0)),   # deep, whole half-res image per batch
                pl.BlockSpec((TH, Hh), lambda n, i: (i, 0)),             # Uh rows for this tile
                pl.BlockSpec((Wh, W), lambda n, i: (0, 0)),              # UwT (shared)
                pl.BlockSpec(memory_space=pltpu.MemorySpace.SMEM),       # merged weights
                pl.BlockSpec(memory_space=pltpu.MemorySpace.SMEM),       # merged bias
            ],
            out_specs=row_block(C),
        ),
        compiler_params=pltpu.CompilerParams(
            dimension_semantics=("parallel", "arbitrary"),
            vmem_limit_bytes=int(vmem_limit_bytes)),
        cost_estimate=pl.CostEstimate(flops=flops, transcendentals=0,
                                      bytes_accessed=bytes_accessed),
    )(skip, edge_att, deep_flat, uh, uwt, wm, bias)
    return out                                               # NCHW, no transposes


# -----------------------------------------------------------------------------
# Pure-JAX reference (same semantics) for correctness checking
# -----------------------------------------------------------------------------
def _upsample_bilinear2x_align_corners(x_nchw):
    N, C, Hi, Wi = x_nchw.shape
    Ho, Wo = 2 * Hi, 2 * Wi

    def axis_coords(out_size, in_size):
        if in_size == 1:
            lo = jnp.zeros((out_size,), jnp.int32)
            return lo, lo, jnp.zeros((out_size,), jnp.float32)
        pos = jnp.arange(out_size, dtype=jnp.float32) * (in_size - 1) / (out_size - 1)
        lo = jnp.floor(pos).astype(jnp.int32)
        hi = jnp.minimum(lo + 1, in_size - 1)
        return lo, hi, pos - lo.astype(jnp.float32)

    hl, hh, hw = axis_coords(Ho, Hi)
    wl, wh, ww = axis_coords(Wo, Wi)

    top = (x_nchw[:, :, hl, :] * (1.0 - hw)[None, None, :, None]
           + x_nchw[:, :, hh, :] * hw[None, None, :, None])
    out = (top[:, :, :, wl] * (1.0 - ww)[None, None, None, :]
           + top[:, :, :, wh] * ww[None, None, None, :])
    return out


def sbg_reference(skip, deep, edge_att, params):
    C = skip.shape[1]
    deep_up = _upsample_bilinear2x_align_corners(deep)

    def branch(x, w, g, b, m, v):
        y = jnp.einsum('oc,nchw->nohw', w.reshape(C, C), x)
        scale = g / jnp.sqrt(v + _BN_EPS)
        return y * scale[None, :, None, None] + (b - m * scale)[None, :, None, None]

    x1 = (1.0 - edge_att) * deep_up + skip
    x2 = deep_up + edge_att * skip
    return (branch(x1, params["w_skip"], params["g_skip"], params["b_skip"],
                   params["m_skip"], params["v_skip"])
            + branch(x2, params["w_deep"], params["g_deep"], params["b_deep"],
                     params["m_deep"], params["v_deep"]))


# -----------------------------------------------------------------------------
if __name__ == "__main__":
    key = jax.random.PRNGKey(0)
    ks = jax.random.split(key, 16)

    C = 4
    params = {
        "w_skip": 0.5 * jax.random.normal(ks[3], (C, C, 1, 1), jnp.float32),
        "w_deep": 0.5 * jax.random.normal(ks[4], (C, C, 1, 1), jnp.float32),
        "g_skip": 1.0 + 0.1 * jax.random.normal(ks[5], (C,), jnp.float32),
        "b_skip": 0.1 * jax.random.normal(ks[6], (C,), jnp.float32),
        "m_skip": 0.1 * jax.random.normal(ks[7], (C,), jnp.float32),
        "v_skip": 1.0 + jnp.abs(jax.random.normal(ks[8], (C,), jnp.float32)),
        "g_deep": 1.0 + 0.1 * jax.random.normal(ks[9], (C,), jnp.float32),
        "b_deep": 0.1 * jax.random.normal(ks[10], (C,), jnp.float32),
        "m_deep": 0.1 * jax.random.normal(ks[11], (C,), jnp.float32),
        "v_deep": 1.0 + jnp.abs(jax.random.normal(ks[12], (C,), jnp.float32)),
    }

    # --- Test 1: evenly tiled shape -----------------------------------------
    N, H, W = 2, 16, 16
    skip = jax.random.normal(ks[0], (N, C, H, W), jnp.float32)
    deep = jax.random.normal(ks[1], (N, C, H // 2, W // 2), jnp.float32)
    edge_att = jax.nn.sigmoid(jax.random.normal(ks[2], (N, 1, H, W), jnp.float32))

    out = jax.block_until_ready(sbg_forward(skip, deep, edge_att, params))
    ref = jax.block_until_ready(sbg_reference(skip, deep, edge_att, params))
    assert out.shape == (N, C, H, W), out.shape
    err = float(jnp.abs(out - ref).max())
    assert jnp.allclose(out, ref, atol=1e-4, rtol=1e-4), err

    # --- Test 2: ragged last row tile (H % row_tile != 0) -------------------
    H2 = W2 = 24
    skip2 = jax.random.normal(ks[13], (N, C, H2, W2), jnp.float32)
    deep2 = jax.random.normal(ks[14], (N, C, H2 // 2, W2 // 2), jnp.float32)
    edge2 = jax.nn.sigmoid(jax.random.normal(ks[15], (N, 1, H2, W2), jnp.float32))

    out2 = jax.block_until_ready(
        sbg_forward(skip2, deep2, edge2, params, row_tile=16))
    ref2 = jax.block_until_ready(sbg_reference(skip2, deep2, edge2, params))
    assert out2.shape == (N, C, H2, W2), out2.shape
    err2 = float(jnp.abs(out2 - ref2).max())
    assert jnp.allclose(out2, ref2, atol=1e-4, rtol=1e-4), err2

    print("KERNEL_OK")
</pallas_src>

<mosaic_0001>
module attributes {stable_mosaic.version = 11 : i64} {
  func.func @_sbg_kernel(%arg0: i32, %arg1: i32, %arg2: memref<1x4x16x16xf32, #tpu.memory_space<vmem>>, %arg3: memref<1x1x16x16xf32, #tpu.memory_space<vmem>>, %arg4: memref<1x8x32xf32, #tpu.memory_space<vmem>>, %arg5: memref<16x8xf32, #tpu.memory_space<vmem>>, %arg6: memref<8x16xf32, #tpu.memory_space<vmem>>, %arg7: memref<8x4xf32, #tpu.memory_space<smem>>, %arg8: memref<4xf32, #tpu.memory_space<smem>>, %arg9: memref<1x4x16x16xf32, #tpu.memory_space<vmem>>) attributes {dimension_semantics = [#tpu.dimension_semantics<parallel>, #tpu.dimension_semantics<arbitrary>], iteration_bounds = array<i64: 2, 1>, scalar_prefetch = 0 : i64, scratch_operands = 0 : i64, tpu.core_type = #tpu.core_type<tc>, window_params = [{transform_indices = @transform_0, window_bounds = array<i64: 1, 4, 16, 16>}, {transform_indices = @transform_1, window_bounds = array<i64: 1, 1, 16, 16>}, {transform_indices = @transform_2, window_bounds = array<i64: 1, 8, 32>}, {transform_indices = @transform_3, window_bounds = array<i64: 16, 8>}, {pipeline_mode = #tpu.pipeline_mode<synchronous>, transform_indices = @transform_4, window_bounds = array<i64: 8, 16>}, {transform_indices = @transform_5, window_bounds = array<i64: 8, 4>}, {transform_indices = @transform_6, window_bounds = array<i64: 4>}, {transform_indices = @transform_7, window_bounds = array<i64: 1, 4, 16, 16>}]} {
    %c0 = arith.constant 0 : index
    %c0_0 = arith.constant 0 : index
    %c0_1 = arith.constant 0 : index
    %c0_2 = arith.constant 0 : index
    %0 = vector.load %arg3[%c0, %c0_0, %c0_1, %c0_2] : memref<1x1x16x16xf32, #tpu.memory_space<vmem>>, vector<1x1x16x16xf32>
    %1 = vector.shape_cast %0 : vector<1x1x16x16xf32> to vector<16x16xf32>
    %cst = arith.constant 1.000000e+00 : f32
    %2 = vector.broadcast %cst : f32 to vector<16x16xf32>
    %3 = arith.subf %2, %1 : vector<16x16xf32>
    %c0_3 = arith.constant 0 : index
    %c0_4 = arith.constant 0 : index
    %4 = vector.load %arg6[%c0_3, %c0_4] : memref<8x16xf32, #tpu.memory_space<vmem>>, vector<8x16xf32>
    %c0_5 = arith.constant 0 : index
    %c0_6 = arith.constant 0 : index
    %5 = vector.load %arg5[%c0_5, %c0_6] : memref<16x8xf32, #tpu.memory_space<vmem>>, vector<16x8xf32>
    %c0_7 = arith.constant 0 : index
    %c0_8 = arith.constant 0 : index
    %c0_9 = arith.constant 0 : index
    %6 = vector.load %arg4[%c0_7, %c0_8, %c0_9] : memref<1x8x32xf32, #tpu.memory_space<vmem>>, vector<1x8x32xf32>
    %7 = vector.shape_cast %6 : vector<1x8x32xf32> to vector<8x32xf32>
    %cst_10 = arith.constant dense<0.000000e+00> : vector<16x32xf32>
    %8 = tpu.matmul %5, %7, %cst_10 {dimension_numbers = #tpu.dot_dimension_numbers<[1], [0], [0], [1], [0, 0, 1, 1], [], []>} : vector<16x8xf32>, vector<8x32xf32>, vector<16x32xf32> -> vector<16x32xf32>
    %9 = vector.extract_strided_slice %8 {offsets = [0, 0], sizes = [16, 8], strides = [1, 1]} : vector<16x32xf32> to vector<16x8xf32>
    %cst_11 = arith.constant dense<0.000000e+00> : vector<16x16xf32>
    %10 = tpu.matmul %9, %4, %cst_11 {dimension_numbers = #tpu.dot_dimension_numbers<[1], [0], [0], [1], [0, 0, 1, 1], [], []>} : vector<16x8xf32>, vector<8x16xf32>, vector<16x16xf32> -> vector<16x16xf32>
    %c0_12 = arith.constant 0 : index
    %c0_13 = arith.constant 0 : index
    %c0_14 = arith.constant 0 : index
    %c0_15 = arith.constant 0 : index
    %11 = vector.load %arg2[%c0_12, %c0_13, %c0_14, %c0_15] : memref<1x4x16x16xf32, #tpu.memory_space<vmem>>, vector<1x1x16x16xf32>
    %12 = vector.shape_cast %11 : vector<1x1x16x16xf32> to vector<16x16xf32>
    %13 = arith.mulf %3, %10 : vector<16x16xf32>
    %14 = arith.addf %13, %12 : vector<16x16xf32>
    %15 = arith.mulf %1, %12 : vector<16x16xf32>
    %16 = arith.addf %10, %15 : vector<16x16xf32>
    %c0_16 = arith.constant 0 : index
    %c0_17 = arith.constant 0 : index
    %17 = memref.load %arg7[%c0_16, %c0_17] : memref<8x4xf32, #tpu.memory_space<smem>>
    %18 = vector.broadcast %17 : f32 to vector<16x16xf32>
    %19 = arith.mulf %14, %18 : vector<16x16xf32>
    %c4 = arith.constant 4 : index
    %c0_18 = arith.constant 0 : index
    %20 = memref.load %arg7[%c4, %c0_18] : memref<8x4xf32, #tpu.memory_space<smem>>
    %21 = vector.broadcast %20 : f32 to vector<16x16xf32>
    %22 = arith.mulf %16, %21 : vector<16x16xf32>
    %23 = arith.addf %19, %22 : vector<16x16xf32>
    %c0_19 = arith.constant 0 : index
    %24 = memref.load %arg8[%c0_19] : memref<4xf32, #tpu.memory_space<smem>>
    %25 = vector.broadcast %24 : f32 to vector<16x16xf32>
    %26 = arith.addf %25, %23 : vector<16x16xf32>
    %c0_20 = arith.constant 0 : index
    %c0_21 = arith.constant 0 : index
    %c0_22 = arith.constant 0 : index
    %c0_23 = arith.constant 0 : index
    %27 = vector.load %arg9[%c0_20, %c0_21, %c0_22, %c0_23] : memref<1x4x16x16xf32, #tpu.memory_space<vmem>>, vector<1x1x16x16xf32>
    %28 = vector.shape_cast %27 : vector<1x1x16x16xf32> to vector<16x16xf32>
    %29 = vector.shape_cast %26 : vector<16x16xf32> to vector<1x1x16x16xf32>
    tpu.vector_store %arg9[%c0_20, %c0_21, %c0_22, %c0_23], %29 {strides = array<i32>} : memref<1x4x16x16xf32, #tpu.memory_space<vmem>>, vector<1x1x16x16xf32>,
    %c0_24 = arith.constant 0 : index
    %c1 = arith.constant 1 : index
    %30 = memref.load %arg7[%c0_24, %c1] : memref<8x4xf32, #tpu.memory_space<smem>>
    %31 = vector.broadcast %30 : f32 to vector<16x16xf32>
    %32 = arith.mulf %14, %31 : vector<16x16xf32>
    %c4_25 = arith.constant 4 : index
    %c1_26 = arith.constant 1 : index
    %33 = memref.load %arg7[%c4_25, %c1_26] : memref<8x4xf32, #tpu.memory_space<smem>>
    %34 = vector.broadcast %33 : f32 to vector<16x16xf32>
    %35 = arith.mulf %16, %34 : vector<16x16xf32>
    %36 = arith.addf %32, %35 : vector<16x16xf32>
    %c1_27 = arith.constant 1 : index
    %37 = memref.load %arg8[%c1_27] : memref<4xf32, #tpu.memory_space<smem>>
    %38 = vector.broadcast %37 : f32 to vector<16x16xf32>
    %39 = arith.addf %38, %36 : vector<16x16xf32>
    %c0_28 = arith.constant 0 : index
    %c1_29 = arith.constant 1 : index
    %c0_30 = arith.constant 0 : index
    %c0_31 = arith.constant 0 : index
    %40 = vector.load %arg9[%c0_28, %c1_29, %c0_30, %c0_31] : memref<1x4x16x16xf32, #tpu.memory_space<vmem>>, vector<1x1x16x16xf32>
    %41 = vector.shape_cast %40 : vector<1x1x16x16xf32> to vector<16x16xf32>
    %42 = vector.shape_cast %39 : vector<16x16xf32> to vector<1x1x16x16xf32>
    tpu.vector_store %arg9[%c0_28, %c1_29, %c0_30, %c0_31], %42 {strides = array<i32>} : memref<1x4x16x16xf32, #tpu.memory_space<vmem>>, vector<1x1x16x16xf32>,
    %c0_32 = arith.constant 0 : index
    %c2 = arith.constant 2 : index
    %43 = memref.load %arg7[%c0_32, %c2] : memref<8x4xf32, #tpu.memory_space<smem>>
    %44 = vector.broadcast %43 : f32 to vector<16x16xf32>
    %45 = arith.mulf %14, %44 : vector<16x16xf32>
    %c4_33 = arith.constant 4 : index
    %c2_34 = arith.constant 2 : index
    %46 = memref.load %arg7[%c4_33, %c2_34] : memref<8x4xf32, #tpu.memory_space<smem>>
    %47 = vector.broadcast %46 : f32 to vector<16x16xf32>
    %48 = arith.mulf %16, %47 : vector<16x16xf32>
    %49 = arith.addf %45, %48 : vector<16x16xf32>
    %c2_35 = arith.constant 2 : index
    %50 = memref.load %arg8[%c2_35] : memref<4xf32, #tpu.memory_space<smem>>
    %51 = vector.broadcast %50 : f32 to vector<16x16xf32>
    %52 = arith.addf %51, %49 : vector<16x16xf32>
    %c0_36 = arith.constant 0 : index
    %c2_37 = arith.constant 2 : index
    %c0_38 = arith.constant 0 : index
    %c0_39 = arith.constant 0 : index
    %53 = vector.load %arg9[%c0_36, %c2_37, %c0_38, %c0_39] : memref<1x4x16x16xf32, #tpu.memory_space<vmem>>, vector<1x1x16x16xf32>
    %54 = vector.shape_cast %53 : vector<1x1x16x16xf32> to vector<16x16xf32>
    %55 = vector.shape_cast %52 : vector<16x16xf32> to vector<1x1x16x16xf32>
    tpu.vector_store %arg9[%c0_36, %c2_37, %c0_38, %c0_39], %55 {strides = array<i32>} : memref<1x4x16x16xf32, #tpu.memory_space<vmem>>, vector<1x1x16x16xf32>,
    %c0_40 = arith.constant 0 : index
    %c3 = arith.constant 3 : index
    %56 = memref.load %arg7[%c0_40, %c3] : memref<8x4xf32, #tpu.memory_space<smem>>
    %57 = vector.broadcast %56 : f32 to vector<16x16xf32>
    %58 = arith.mulf %14, %57 : vector<16x16xf32>
    %c4_41 = arith.constant 4 : index
    %c3_42 = arith.constant 3 : index
    %59 = memref.load %arg7[%c4_41, %c3_42] : memref<8x4xf32, #tpu.memory_space<smem>>
    %60 = vector.broadcast %59 : f32 to vector<16x16xf32>
    %61 = arith.mulf %16, %60 : vector<16x16xf32>
    %62 = arith.addf %58, %61 : vector<16x16xf32>
    %c3_43 = arith.constant 3 : index
    %63 = memref.load %arg8[%c3_43] : memref<4xf32, #tpu.memory_space<smem>>
    %64 = vector.broadcast %63 : f32 to vector<16x16xf32>
    %65 = arith.addf %64, %62 : vector<16x16xf32>
    %c0_44 = arith.constant 0 : index
    %c3_45 = arith.constant 3 : index
    %c0_46 = arith.constant 0 : index
    %c0_47 = arith.constant 0 : index
    %66 = vector.load %arg9[%c0_44, %c3_45, %c0_46, %c0_47] : memref<1x4x16x16xf32, #tpu.memory_space<vmem>>, vector<1x1x16x16xf32>
    %67 = vector.shape_cast %66 : vector<1x1x16x16xf32> to vector<16x16xf32>
    %68 = vector.shape_cast %65 : vector<16x16xf32> to vector<1x1x16x16xf32>
    tpu.vector_store %arg9[%c0_44, %c3_45, %c0_46, %c0_47], %68 {strides = array<i32>} : memref<1x4x16x16xf32, #tpu.memory_space<vmem>>, vector<1x1x16x16xf32>,
    %69 = vector.extract_strided_slice %8 {offsets = [0, 8], sizes = [16, 8], strides = [1, 1]} : vector<16x32xf32> to vector<16x8xf32>
    %cst_48 = arith.constant dense<0.000000e+00> : vector<16x16xf32>
    %70 = tpu.matmul %69, %4, %cst_48 {dimension_numbers = #tpu.dot_dimension_numbers<[1], [0], [0], [1], [0, 0, 1, 1], [], []>} : vector<16x8xf32>, vector<8x16xf32>, vector<16x16xf32> -> vector<16x16xf32>
    %c0_49 = arith.constant 0 : index
    %c1_50 = arith.constant 1 : index
    %c0_51 = arith.constant 0 : index
    %c0_52 = arith.constant 0 : index
    %71 = vector.load %arg2[%c0_49, %c1_50, %c0_51, %c0_52] : memref<1x4x16x16xf32, #tpu.memory_space<vmem>>, vector<1x1x16x16xf32>
    %72 = vector.shape_cast %71 : vector<1x1x16x16xf32> to vector<16x16xf32>
    %73 = arith.mulf %3, %70 : vector<16x16xf32>
    %74 = arith.addf %73, %72 : vector<16x16xf32>
    %75 = arith.mulf %1, %72 : vector<16x16xf32>
    %76 = arith.addf %70, %75 : vector<16x16xf32>
    %c1_53 = arith.constant 1 : index
    %c0_54 = arith.constant 0 : index
    %77 = memref.load %arg7[%c1_53, %c0_54] : memref<8x4xf32, #tpu.memory_space<smem>>
    %78 = vector.broadcast %77 : f32 to vector<16x16xf32>
    %79 = arith.mulf %74, %78 : vector<16x16xf32>
    %c5 = arith.constant 5 : index
    %c0_55 = arith.constant 0 : index
    %80 = memref.load %arg7[%c5, %c0_55] : memref<8x4xf32, #tpu.memory_space<smem>>
    %81 = vector.broadcast %80 : f32 to vector<16x16xf32>
    %82 = arith.mulf %76, %81 : vector<16x16xf32>
    %83 = arith.addf %79, %82 : vector<16x16xf32>
    %c0_56 = arith.constant 0 : index
    %c0_57 = arith.constant 0 : index
    %c0_58 = arith.constant 0 : index
    %c0_59 = arith.constant 0 : index
    %84 = vector.load %arg9[%c0_56, %c0_57, %c0_58, %c0_59] : memref<1x4x16x16xf32, #tpu.memory_space<vmem>>, vector<1x1x16x16xf32>
    %85 = vector.shape_cast %84 : vector<1x1x16x16xf32> to vector<16x16xf32>
    %86 = arith.addf %85, %83 : vector<16x16xf32>
    %c0_60 = arith.constant 0 : index
    %c0_61 = arith.constant 0 : index
    %c0_62 = arith.constant 0 : index
    %c0_63 = arith.constant 0 : index
    %87 = vector.load %arg9[%c0_60, %c0_61, %c0_62, %c0_63] : memref<1x4x16x16xf32, #tpu.memory_space<vmem>>, vector<1x1x16x16xf32>
    %88 = vector.shape_cast %87 : vector<1x1x16x16xf32> to vector<16x16xf32>
    %89 = vector.shape_cast %86 : vector<16x16xf32> to vector<1x1x16x16xf32>
    tpu.vector_store %arg9[%c0_60, %c0_61, %c0_62, %c0_63], %89 {strides = array<i32>} : memref<1x4x16x16xf32, #tpu.memory_space<vmem>>, vector<1x1x16x16xf32>,
    %c1_64 = arith.constant 1 : index
    %c1_65 = arith.constant 1 : index
    %90 = memref.load %arg7[%c1_64, %c1_65] : memref<8x4xf32, #tpu.memory_space<smem>>
    %91 = vector.broadcast %90 : f32 to vector<16x16xf32>
    %92 = arith.mulf %74, %91 : vector<16x16xf32>
    %c5_66 = arith.constant 5 : index
    %c1_67 = arith.constant 1 : index
    %93 = memref.load %arg7[%c5_66, %c1_67] : memref<8x4xf32, #tpu.memory_space<smem>>
    %94 = vector.broadcast %93 : f32 to vector<16x16xf32>
    %95 = arith.mulf %76, %94 : vector<16x16xf32>
    %96 = arith.addf %92, %95 : vector<16x16xf32>
    %c0_68 = arith.constant 0 : index
    %c1_69 = arith.constant 1 : index
    %c0_70 = arith.constant 0 : index
    %c0_71 = arith.constant 0 : index
    %97 = vector.load %arg9[%c0_68, %c1_69, %c0_70, %c0_71] : memref<1x4x16x16xf32, #tpu.memory_space<vmem>>, vector<1x1x16x16xf32>
    %98 = vector.shape_cast %97 : vector<1x1x16x16xf32> to vector<16x16xf32>
    %99 = arith.addf %98, %96 : vector<16x16xf32>
    %c0_72 = arith.constant 0 : index
    %c1_73 = arith.constant 1 : index
    %c0_74 = arith.constant 0 : index
    %c0_75 = arith.constant 0 : index
    %100 = vector.load %arg9[%c0_72, %c1_73, %c0_74, %c0_75] : memref<1x4x16x16xf32, #tpu.memory_space<vmem>>, vector<1x1x16x16xf32>
    %101 = vector.shape_cast %100 : vector<1x1x16x16xf32> to vector<16x16xf32>
    %102 = vector.shape_cast %99 : vector<16x16xf32> to vector<1x1x16x16xf32>
    tpu.vector_store %arg9[%c0_72, %c1_73, %c0_74, %c0_75], %102 {strides = array<i32>} : memref<1x4x16x16xf32, #tpu.memory_space<vmem>>, vector<1x1x16x16xf32>,
    %c1_76 = arith.constant 1 : index
    %c2_77 = arith.constant 2 : index
    %103 = memref.load %arg7[%c1_76, %c2_77] : memref<8x4xf32, #tpu.memory_space<smem>>
    %104 = vector.broadcast %103 : f32 to vector<16x16xf32>
    %105 = arith.mulf %74, %104 : vector<16x16xf32>
    %c5_78 = arith.constant 5 : index
    %c2_79 = arith.constant 2 : index
    %106 = memref.load %arg7[%c5_78, %c2_79] : memref<8x4xf32, #tpu.memory_space<smem>>
    %107 = vector.broadcast %106 : f32 to vector<16x16xf32>
    %108 = arith.mulf %76, %107 : vector<16x16xf32>
    %109 = arith.addf %105, %108 : vector<16x16xf32>
    %c0_80 = arith.constant 0 : index
    %c2_81 = arith.constant 2 : index
    %c0_82 = arith.constant 0 : index
    %c0_83 = arith.constant 0 : index
    %110 = vector.load %arg9[%c0_80, %c2_81, %c0_82, %c0_83] : memref<1x4x16x16xf32, #tpu.memory_space<vmem>>, vector<1x1x16x16xf32>
    %111 = vector.shape_cast %110 : vector<1x1x16x16xf32> to vector<16x16xf32>
    %112 = arith.addf %111, %109 : vector<16x16xf32>
    %c0_84 = arith.constant 0 : index
    %c2_85 = arith.constant 2 : index
    %c0_86 = arith.constant 0 : index
    %c0_87 = arith.constant 0 : index
    %113 = vector.load %arg9[%c0_84, %c2_85, %c0_86, %c0_87] : memref<1x4x16x16xf32, #tpu.memory_space<vmem>>, vector<1x1x16x16xf32>
    %114 = vector.shape_cast %113 : vector<1x1x16x16xf32> to vector<16x16xf32>
    %115 = vector.shape_cast %112 : vector<16x16xf32> to vector<1x1x16x16xf32>
    tpu.vector_store %arg9[%c0_84, %c2_85, %c0_86, %c0_87], %115 {strides = array<i32>} : memref<1x4x16x16xf32, #tpu.memory_space<vmem>>, vector<1x1x16x16xf32>,
    %c1_88 = arith.constant 1 : index
    %c3_89 = arith.constant 3 : index
    %116 = memref.load %arg7[%c1_88, %c3_89] : memref<8x4xf32, #tpu.memory_space<smem>>
    %117 = vector.broadcast %116 : f32 to vector<16x16xf32>
    %118 = arith.mulf %74, %117 : vector<16x16xf32>
    %c5_90 = arith.constant 5 : index
    %c3_91 = arith.constant 3 : index
    %119 = memref.load %arg7[%c5_90, %c3_91] : memref<8x4xf32, #tpu.memory_space<smem>>
    %120 = vector.broadcast %119 : f32 to vector<16x16xf32>
    %121 = arith.mulf %76, %120 : vector<16x16xf32>
    %122 = arith.addf %118, %121 : vector<16x16xf32>
    %c0_92 = arith.constant 0 : index
    %c3_93 = arith.constant 3 : index
    %c0_94 = arith.constant 0 : index
    %c0_95 = arith.constant 0 : index
    %123 = vector.load %arg9[%c0_92, %c3_93, %c0_94, %c0_95] : memref<1x4x16x16xf32, #tpu.memory_space<vmem>>, vector<1x1x16x16xf32>
    %124 = vector.shape_cast %123 : vector<1x1x16x16xf32> to vector<16x16xf32>
    %125 = arith.addf %124, %122 : vector<16x16xf32>
    %c0_96 = arith.constant 0 : index
    %c3_97 = arith.constant 3 : index
    %c0_98 = arith.constant 0 : index
    %c0_99 = arith.constant 0 : index
    %126 = vector.load %arg9[%c0_96, %c3_97, %c0_98, %c0_99] : memref<1x4x16x16xf32, #tpu.memory_space<vmem>>, vector<1x1x16x16xf32>
    %127 = vector.shape_cast %126 : vector<1x1x16x16xf32> to vector<16x16xf32>
    %128 = vector.shape_cast %125 : vector<16x16xf32> to vector<1x1x16x16xf32>
    tpu.vector_store %arg9[%c0_96, %c3_97, %c0_98, %c0_99], %128 {strides = array<i32>} : memref<1x4x16x16xf32, #tpu.memory_space<vmem>>, vector<1x1x16x16xf32>,
    %129 = vector.extract_strided_slice %8 {offsets = [0, 16], sizes = [16, 8], strides = [1, 1]} : vector<16x32xf32> to vector<16x8xf32>
    %cst_100 = arith.constant dense<0.000000e+00> : vector<16x16xf32>
    %130 = tpu.matmul %129, %4, %cst_100 {dimension_numbers = #tpu.dot_dimension_numbers<[1], [0], [0], [1], [0, 0, 1, 1], [], []>} : vector<16x8xf32>, vector<8x16xf32>, vector<16x16xf32> -> vector<16x16xf32>
    %c0_101 = arith.constant 0 : index
    %c2_102 = arith.constant 2 : index
    %c0_103 = arith.constant 0 : index
    %c0_104 = arith.constant 0 : index
    %131 = vector.load %arg2[%c0_101, %c2_102, %c0_103, %c0_104] : memref<1x4x16x16xf32, #tpu.memory_space<vmem>>, vector<1x1x16x16xf32>
    %132 = vector.shape_cast %131 : vector<1x1x16x16xf32> to vector<16x16xf32>
    %133 = arith.mulf %3, %130 : vector<16x16xf32>
    %134 = arith.addf %133, %132 : vector<16x16xf32>
    %135 = arith.mulf %1, %132 : vector<16x16xf32>
    %136 = arith.addf %130, %135 : vector<16x16xf32>
    %c2_105 = arith.constant 2 : index
    %c0_106 = arith.constant 0 : index
    %137 = memref.load %arg7[%c2_105, %c0_106] : memref<8x4xf32, #tpu.memory_space<smem>>
    %138 = vector.broadcast %137 : f32 to vector<16x16xf32>
    %139 = arith.mulf %134, %138 : vector<16x16xf32>
    %c6 = arith.constant 6 : index
    %c0_107 = arith.constant 0 : index
    %140 = memref.load %arg7[%c6, %c0_107] : memref<8x4xf32, #tpu.memory_space<smem>>
    %141 = vector.broadcast %140 : f32 to vector<16x16xf32>
    %142 = arith.mulf %136, %141 : vector<16x16xf32>
    %143 = arith.addf %139, %142 : vector<16x16xf32>
    %c0_108 = arith.constant 0 : index
    %c0_109 = arith.constant 0 : index
    %c0_110 = arith.constant 0 : index
    %c0_111 = arith.constant 0 : index
    %144 = vector.load %arg9[%c0_108, %c0_109, %c0_110, %c0_111] : memref<1x4x16x16xf32, #tpu.memory_space<vmem>>, vector<1x1x16x16xf32>
    %145 = vector.shape_cast %144 : vector<1x1x16x16xf32> to vector<16x16xf32>
    %146 = arith.addf %145, %143 : vector<16x16xf32>
    %c0_112 = arith.constant 0 : index
    %c0_113 = arith.constant 0 : index
    %c0_114 = arith.constant 0 : index
    %c0_115 = arith.constant 0 : index
    %147 = vector.load %arg9[%c0_112, %c0_113, %c0_114, %c0_115] : memref<1x4x16x16xf32, #tpu.memory_space<vmem>>, vector<1x1x16x16xf32>
    %148 = vector.shape_cast %147 : vector<1x1x16x16xf32> to vector<16x16xf32>
    %149 = vector.shape_cast %146 : vector<16x16xf32> to vector<1x1x16x16xf32>
    tpu.vector_store %arg9[%c0_112, %c0_113, %c0_114, %c0_115], %149 {strides = array<i32>} : memref<1x4x16x16xf32, #tpu.memory_space<vmem>>, vector<1x1x16x16xf32>,
    %c2_116 = arith.constant 2 : index
    %c1_117 = arith.constant 1 : index
    %150 = memref.load %arg7[%c2_116, %c1_117] : memref<8x4xf32, #tpu.memory_space<smem>>
    %151 = vector.broadcast %150 : f32 to vector<16x16xf32>
    %152 = arith.mulf %134, %151 : vector<16x16xf32>
    %c6_118 = arith.constant 6 : index
    %c1_119 = arith.constant 1 : index
    %153 = memref.load %arg7[%c6_118, %c1_119] : memref<8x4xf32, #tpu.memory_space<smem>>
    %154 = vector.broadcast %153 : f32 to vector<16x16xf32>
    %155 = arith.mulf %136, %154 : vector<16x16xf32>
    %156 = arith.addf %152, %155 : vector<16x16xf32>
    %c0_120 = arith.constant 0 : index
    %c1_121 = arith.constant 1 : index
    %c0_122 = arith.constant 0 : index
    %c0_123 = arith.constant 0 : index
    %157 = vector.load %arg9[%c0_120, %c1_121, %c0_122, %c0_123] : memref<1x4x16x16xf32, #tpu.memory_space<vmem>>, vector<1x1x16x16xf32>
    %158 = vector.shape_cast %157 : vector<1x1x16x16xf32> to vector<16x16xf32>
    %159 = arith.addf %158, %156 : vector<16x16xf32>
    %c0_124 = arith.constant 0 : index
    %c1_125 = arith.constant 1 : index
    %c0_126 = arith.constant 0 : index
    %c0_127 = arith.constant 0 : index
    %160 = vector.load %arg9[%c0_124, %c1_125, %c0_126, %c0_127] : memref<1x4x16x16xf32, #tpu.memory_space<vmem>>, vector<1x1x16x16xf32>
    %161 = vector.shape_cast %160 : vector<1x1x16x16xf32> to vector<16x16xf32>
    %162 = vector.shape_cast %159 : vector<16x16xf32> to vector<1x1x16x16xf32>
    tpu.vector_store %arg9[%c0_124, %c1_125, %c0_126, %c0_127], %162 {strides = array<i32>} : memref<1x4x16x16xf32, #tpu.memory_space<vmem>>, vector<1x1x16x16xf32>,
    %c2_128 = arith.constant 2 : index
    %c2_129 = arith.constant 2 : index
    %163 = memref.load %arg7[%c2_128, %c2_129] : memref<8x4xf32, #tpu.memory_space<smem>>
    %164 = vector.broadcast %163 : f32 to vector<16x16xf32>
    %165 = arith.mulf %134, %164 : vector<16x16xf32>
    %c6_130 = arith.constant 6 : index
    %c2_131 = arith.constant 2 : index
    %166 = memref.load %arg7[%c6_130, %c2_131] : memref<8x4xf32, #tpu.memory_space<smem>>
    %167 = vector.broadcast %166 : f32 to vector<16x16xf32>
    %168 = arith.mulf %136, %167 : vector<16x16xf32>
    %169 = arith.addf %165, %168 : vector<16x16xf32>
    %c0_132 = arith.constant 0 : index
    %c2_133 = arith.constant 2 : index
    %c0_134 = arith.constant 0 : index
    %c0_135 = arith.constant 0 : index
    %170 = vector.load %arg9[%c0_132, %c2_133, %c0_134, %c0_135] : memref<1x4x16x16xf32, #tpu.memory_space<vmem>>, vector<1x1x16x16xf32>
    %171 = vector.shape_cast %170 : vector<1x1x16x16xf32> to vector<16x16xf32>
    %172 = arith.addf %171, %169 : vector<16x16xf32>
    %c0_136 = arith.constant 0 : index
    %c2_137 = arith.constant 2 : index
    %c0_138 = arith.constant 0 : index
    %c0_139 = arith.constant 0 : index
    %173 = vector.load %arg9[%c0_136, %c2_137, %c0_138, %c0_139] : memref<1x4x16x16xf32, #tpu.memory_space<vmem>>, vector<1x1x16x16xf32>
    %174 = vector.shape_cast %173 : vector<1x1x16x16xf32> to vector<16x16xf32>
    %175 = vector.shape_cast %172 : vector<16x16xf32> to vector<1x1x16x16xf32>
    tpu.vector_store %arg9[%c0_136, %c2_137, %c0_138, %c0_139], %175 {strides = array<i32>} : memref<1x4x16x16xf32, #tpu.memory_space<vmem>>, vector<1x1x16x16xf32>,
    %c2_140 = arith.constant 2 : index
    %c3_141 = arith.constant 3 : index
    %176 = memref.load %arg7[%c2_140, %c3_141] : memref<8x4xf32, #tpu.memory_space<smem>>
    %177 = vector.broadcast %176 : f32 to vector<16x16xf32>
    %178 = arith.mulf %134, %177 : vector<16x16xf32>
    %c6_142 = arith.constant 6 : index
    %c3_143 = arith.constant 3 : index
    %179 = memref.load %arg7[%c6_142, %c3_143] : memref<8x4xf32, #tpu.memory_space<smem>>
    %180 = vector.broadcast %179 : f32 to vector<16x16xf32>
    %181 = arith.mulf %136, %180 : vector<16x16xf32>
    %182 = arith.addf %178, %181 : vector<16x16xf32>
    %c0_144 = arith.constant 0 : index
    %c3_145 = arith.constant 3 : index
    %c0_146 = arith.constant 0 : index
    %c0_147 = arith.constant 0 : index
    %183 = vector.load %arg9[%c0_144, %c3_145, %c0_146, %c0_147] : memref<1x4x16x16xf32, #tpu.memory_space<vmem>>, vector<1x1x16x16xf32>
    %184 = vector.shape_cast %183 : vector<1x1x16x16xf32> to vector<16x16xf32>
    %185 = arith.addf %184, %182 : vector<16x16xf32>
    %c0_148 = arith.constant 0 : index
    %c3_149 = arith.constant 3 : index
    %c0_150 = arith.constant 0 : index
    %c0_151 = arith.constant 0 : index
    %186 = vector.load %arg9[%c0_148, %c3_149, %c0_150, %c0_151] : memref<1x4x16x16xf32, #tpu.memory_space<vmem>>, vector<1x1x16x16xf32>
    %187 = vector.shape_cast %186 : vector<1x1x16x16xf32> to vector<16x16xf32>
    %188 = vector.shape_cast %185 : vector<16x16xf32> to vector<1x1x16x16xf32>
    tpu.vector_store %arg9[%c0_148, %c3_149, %c0_150, %c0_151], %188 {strides = array<i32>} : memref<1x4x16x16xf32, #tpu.memory_space<vmem>>, vector<1x1x16x16xf32>,
    %189 = vector.extract_strided_slice %8 {offsets = [0, 24], sizes = [16, 8], strides = [1, 1]} : vector<16x32xf32> to vector<16x8xf32>
    %cst_152 = arith.constant dense<0.000000e+00> : vector<16x16xf32>
    %190 = tpu.matmul %189, %4, %cst_152 {dimension_numbers = #tpu.dot_dimension_numbers<[1], [0], [0], [1], [0, 0, 1, 1], [], []>} : vector<16x8xf32>, vector<8x16xf32>, vector<16x16xf32> -> vector<16x16xf32>
    %c0_153 = arith.constant 0 : index
    %c3_154 = arith.constant 3 : index
    %c0_155 = arith.constant 0 : index
    %c0_156 = arith.constant 0 : index
    %191 = vector.load %arg2[%c0_153, %c3_154, %c0_155, %c0_156] : memref<1x4x16x16xf32, #tpu.memory_space<vmem>>, vector<1x1x16x16xf32>
    %192 = vector.shape_cast %191 : vector<1x1x16x16xf32> to vector<16x16xf32>
    %193 = arith.mulf %3, %190 : vector<16x16xf32>
    %194 = arith.addf %193, %192 : vector<16x16xf32>
    %195 = arith.mulf %1, %192 : vector<16x16xf32>
    %196 = arith.addf %190, %195 : vector<16x16xf32>
    %c3_157 = arith.constant 3 : index
    %c0_158 = arith.constant 0 : index
    %197 = memref.load %arg7[%c3_157, %c0_158] : memref<8x4xf32, #tpu.memory_space<smem>>
    %198 = vector.broadcast %197 : f32 to vector<16x16xf32>
    %199 = arith.mulf %194, %198 : vector<16x16xf32>
    %c7 = arith.constant 7 : index
    %c0_159 = arith.constant 0 : index
    %200 = memref.load %arg7[%c7, %c0_159] : memref<8x4xf32, #tpu.memory_space<smem>>
    %201 = vector.broadcast %200 : f32 to vector<16x16xf32>
    %202 = arith.mulf %196, %201 : vector<16x16xf32>
    %203 = arith.addf %199, %202 : vector<16x16xf32>
    %c0_160 = arith.constant 0 : index
    %c0_161 = arith.constant 0 : index
    %c0_162 = arith.constant 0 : index
    %c0_163 = arith.constant 0 : index
    %204 = vector.load %arg9[%c0_160, %c0_161, %c0_162, %c0_163] : memref<1x4x16x16xf32, #tpu.memory_space<vmem>>, vector<1x1x16x16xf32>
    %205 = vector.shape_cast %204 : vector<1x1x16x16xf32> to vector<16x16xf32>
    %206 = arith.addf %205, %203 : vector<16x16xf32>
    %c0_164 = arith.constant 0 : index
    %c0_165 = arith.constant 0 : index
    %c0_166 = arith.constant 0 : index
    %c0_167 = arith.constant 0 : index
    %207 = vector.load %arg9[%c0_164, %c0_165, %c0_166, %c0_167] : memref<1x4x16x16xf32, #tpu.memory_space<vmem>>, vector<1x1x16x16xf32>
    %208 = vector.shape_cast %207 : vector<1x1x16x16xf32> to vector<16x16xf32>
    %209 = vector.shape_cast %206 : vector<16x16xf32> to vector<1x1x16x16xf32>
    tpu.vector_store %arg9[%c0_164, %c0_165, %c0_166, %c0_167], %209 {strides = array<i32>} : memref<1x4x16x16xf32, #tpu.memory_space<vmem>>, vector<1x1x16x16xf32>,
    %c3_168 = arith.constant 3 : index
    %c1_169 = arith.constant 1 : index
    %210 = memref.load %arg7[%c3_168, %c1_169] : memref<8x4xf32, #tpu.memory_space<smem>>
    %211 = vector.broadcast %210 : f32 to vector<16x16xf32>
    %212 = arith.mulf %194, %211 : vector<16x16xf32>
    %c7_170 = arith.constant 7 : index
    %c1_171 = arith.constant 1 : index
    %213 = memref.load %arg7[%c7_170, %c1_171] : memref<8x4xf32, #tpu.memory_space<smem>>
    %214 = vector.broadcast %213 : f32 to vector<16x16xf32>
    %215 = arith.mulf %196, %214 : vector<16x16xf32>
    %216 = arith.addf %212, %215 : vector<16x16xf32>
    %c0_172 = arith.constant 0 : index
    %c1_173 = arith.constant 1 : index
    %c0_174 = arith.constant 0 : index
    %c0_175 = arith.constant 0 : index
    %217 = vector.load %arg9[%c0_172, %c1_173, %c0_174, %c0_175] : memref<1x4x16x16xf32, #tpu.memory_space<vmem>>, vector<1x1x16x16xf32>
    %218 = vector.shape_cast %217 : vector<1x1x16x16xf32> to vector<16x16xf32>
    %219 = arith.addf %218, %216 : vector<16x16xf32>
    %c0_176 = arith.constant 0 : index
    %c1_177 = arith.constant 1 : index
    %c0_178 = arith.constant 0 : index
    %c0_179 = arith.constant 0 : index
    %220 = vector.load %arg9[%c0_176, %c1_177, %c0_178, %c0_179] : memref<1x4x16x16xf32, #tpu.memory_space<vmem>>, vector<1x1x16x16xf32>
    %221 = vector.shape_cast %220 : vector<1x1x16x16xf32> to vector<16x16xf32>
    %222 = vector.shape_cast %219 : vector<16x16xf32> to vector<1x1x16x16xf32>
    tpu.vector_store %arg9[%c0_176, %c1_177, %c0_178, %c0_179], %222 {strides = array<i32>} : memref<1x4x16x16xf32, #tpu.memory_space<vmem>>, vector<1x1x16x16xf32>,
    %c3_180 = arith.constant 3 : index
    %c2_181 = arith.constant 2 : index
    %223 = memref.load %arg7[%c3_180, %c2_181] : memref<8x4xf32, #tpu.memory_space<smem>>
    %224 = vector.broadcast %223 : f32 to vector<16x16xf32>
    %225 = arith.mulf %194, %224 : vector<16x16xf32>
    %c7_182 = arith.constant 7 : index
    %c2_183 = arith.constant 2 : index
    %226 = memref.load %arg7[%c7_182, %c2_183] : memref<8x4xf32, #tpu.memory_space<smem>>
    %227 = vector.broadcast %226 : f32 to vector<16x16xf32>
    %228 = arith.mulf %196, %227 : vector<16x16xf32>
    %229 = arith.addf %225, %228 : vector<16x16xf32>
    %c0_184 = arith.constant 0 : index
    %c2_185 = arith.constant 2 : index
    %c0_186 = arith.constant 0 : index
    %c0_187 = arith.constant 0 : index
    %230 = vector.load %arg9[%c0_184, %c2_185, %c0_186, %c0_187] : memref<1x4x16x16xf32, #tpu.memory_space<vmem>>, vector<1x1x16x16xf32>
    %231 = vector.shape_cast %230 : vector<1x1x16x16xf32> to vector<16x16xf32>
    %232 = arith.addf %231, %229 : vector<16x16xf32>
    %c0_188 = arith.constant 0 : index
    %c2_189 = arith.constant 2 : index
    %c0_190 = arith.constant 0 : index
    %c0_191 = arith.constant 0 : index
    %233 = vector.load %arg9[%c0_188, %c2_189, %c0_190, %c0_191] : memref<1x4x16x16xf32, #tpu.memory_space<vmem>>, vector<1x1x16x16xf32>
    %234 = vector.shape_cast %233 : vector<1x1x16x16xf32> to vector<16x16xf32>
    %235 = vector.shape_cast %232 : vector<16x16xf32> to vector<1x1x16x16xf32>
    tpu.vector_store %arg9[%c0_188, %c2_189, %c0_190, %c0_191], %235 {strides = array<i32>} : memref<1x4x16x16xf32, #tpu.memory_space<vmem>>, vector<1x1x16x16xf32>,
    %c3_192 = arith.constant 3 : index
    %c3_193 = arith.constant 3 : index
    %236 = memref.load %arg7[%c3_192, %c3_193] : memref<8x4xf32, #tpu.memory_space<smem>>
    %237 = vector.broadcast %236 : f32 to vector<16x16xf32>
    %238 = arith.mulf %194, %237 : vector<16x16xf32>
    %c7_194 = arith.constant 7 : index
    %c3_195 = arith.constant 3 : index
    %239 = memref.load %arg7[%c7_194, %c3_195] : memref<8x4xf32, #tpu.memory_space<smem>>
    %240 = vector.broadcast %239 : f32 to vector<16x16xf32>
    %241 = arith.mulf %196, %240 : vector<16x16xf32>
    %242 = arith.addf %238, %241 : vector<16x16xf32>
    %c0_196 = arith.constant 0 : index
    %c3_197 = arith.constant 3 : index
    %c0_198 = arith.constant 0 : index
    %c0_199 = arith.constant 0 : index
    %243 = vector.load %arg9[%c0_196, %c3_197, %c0_198, %c0_199] : memref<1x4x16x16xf32, #tpu.memory_space<vmem>>, vector<1x1x16x16xf32>
    %244 = vector.shape_cast %243 : vector<1x1x16x16xf32> to vector<16x16xf32>
    %245 = arith.addf %244, %242 : vector<16x16xf32>
    %c0_200 = arith.constant 0 : index
    %c3_201 = arith.constant 3 : index
    %c0_202 = arith.constant 0 : index
    %c0_203 = arith.constant 0 : index
    %246 = vector.load %arg9[%c0_200, %c3_201, %c0_202, %c0_203] : memref<1x4x16x16xf32, #tpu.memory_space<vmem>>, vector<1x1x16x16xf32>
    %247 = vector.shape_cast %246 : vector<1x1x16x16xf32> to vector<16x16xf32>
    %248 = vector.shape_cast %245 : vector<16x16xf32> to vector<1x1x16x16xf32>
    tpu.vector_store %arg9[%c0_200, %c3_201, %c0_202, %c0_203], %248 {strides = array<i32>} : memref<1x4x16x16xf32, #tpu.memory_space<vmem>>, vector<1x1x16x16xf32>,
    return
  }
  func.func @transform_0(%arg0: i32, %arg1: i32) -> (i32, i32, i32, i32) {
    %c0_i32 = arith.constant 0 : i32
    %c0_i32_0 = arith.constant 0 : i32
    %c0_i32_1 = arith.constant 0 : i32
    return %arg0, %c0_i32, %arg1, %c0_i32_0 : i32, i32, i32, i32
  }
  func.func @transform_1(%arg0: i32, %arg1: i32) -> (i32, i32, i32, i32) {
    %c0_i32 = arith.constant 0 : i32
    %c0_i32_0 = arith.constant 0 : i32
    %c0_i32_1 = arith.constant 0 : i32
    return %arg0, %c0_i32, %arg1, %c0_i32_0 : i32, i32, i32, i32
  }
  func.func @transform_2(%arg0: i32, %arg1: i32) -> (i32, i32, i32) {
    %c0_i32 = arith.constant 0 : i32
    %c0_i32_0 = arith.constant 0 : i32
    %c0_i32_1 = arith.constant 0 : i32
    return %arg0, %c0_i32, %c0_i32_0 : i32, i32, i32
  }
  func.func @transform_3(%arg0: i32, %arg1: i32) -> (i32, i32) {
    %c0_i32 = arith.constant 0 : i32
    %c0_i32_0 = arith.constant 0 : i32
    return %arg1, %c0_i32 : i32, i32
  }
  func.func @transform_4(%arg0: i32, %arg1: i32) -> (i32, i32) {
    %c0_i32 = arith.constant 0 : i32
    %c0_i32_0 = arith.constant 0 : i32
    %c0_i32_1 = arith.constant 0 : i32
    return %c0_i32, %c0_i32_0 : i32, i32
  }
  func.func @transform_5(%arg0: i32, %arg1: i32) -> (i32, i32) {
    %c0_i32 = arith.constant 0 : i32
    %c0_i32_0 = arith.constant 0 : i32
    %c0_i32_1 = arith.constant 0 : i32
    return %c0_i32, %c0_i32_0 : i32, i32
  }
  func.func @transform_6(%arg0: i32, %arg1: i32) -> i32 {
    %c0_i32 = arith.constant 0 : i32
    %c0_i32_0 = arith.constant 0 : i32
    return %c0_i32 : i32
  }
  func.func @transform_7(%arg0: i32, %arg1: i32) -> (i32, i32, i32, i32) {
    %c0_i32 = arith.constant 0 : i32
    %c0_i32_0 = arith.constant 0 : i32
    %c0_i32_1 = arith.constant 0 : i32
    return %arg0, %c0_i32, %arg1, %c0_i32_0 : i32, i32, i32, i32
  }
}

</mosaic_0001>

<bundles_post_ra>
// kernel: tpu_custom_call.1
= control target key start
LH: loop header
LB: loop body
LE: loop exit
PB: predicated region body
PF: predicated region fallthrough
CT: control target
= control target key end

     0   :  { %s2438_s0 = inlined_call_operand.hbm [shape: f32[2,4,16,16], index: 0, kind: input, shape index: {}]   ;;  %s2439_s1 = inlined_call_operand.vmem [shape: f32[2,1,16,16], index: 1, kind: input, shape index: {}]   ;;  %s2440_s2 = inlined_call_operand.hbm [shape: f32[2,8,32], index: 2, kind: input, shape index: {}]   ;;  %s2441_s3 = inlined_call_operand.vmem [shape: f32[16,8], index: 3, kind: input, shape index: {}]   ;;  %s2442_s4 = inlined_call_operand.vmem [shape: f32[8,16], index: 4, kind: input, shape index: {}]   ;;  %s2443_s5 = inlined_call_operand.vmem [shape: f32[8,4], index: 5, kind: input, shape index: {}]   ;;  %s2444_s6 = inlined_call_operand.vmem [shape: f32[4], index: 6, kind: input, shape index: {}]   ;;  %s2445_s7 = inlined_call_operand.hbm [shape: f32[2,4,16,16], index: 7, kind: output, shape index: {}]  }
   0x1   :  { %2455 = sst [smem:[#allocation20_spill]] %s2438_s0 }
   0x2   :  { %2456 = sst [smem:[#allocation21_spill]] %s2443_s5 }
   0x3   :  { %2457 = sst [smem:[#allocation22_spill]] %s2444_s6 }
   0x4   :  { %12 = vsyncpa [#allocation3], 0 }
   0x5   :  { %14 = vsyncpa [#allocation3 + $0x1], 0 }
   0x6   :  { %15 = vsyncpa [#allocation7], 0 }
   0x7   :  { %17 = vsyncpa [#allocation7 + $0x1], 0 }
   0x8   :  { %18 = vsyncpa [#allocation5], 0 }
   0x9   :  { %19 = vsyncpa [#allocation10], 0 }
   0xa   :  { %20 = vsyncpa [#allocation4], 0 }
   0xb   :  { %22 = vsyncpa [#allocation4 + $0x1], 0  ;;  %s1836_s24 = smov 0   ;;  %s1838_s25 = smov 0  }
   0xc   :  { %s1840_s26 = smov 0   ;;  %s1842_s27 = smov 0  }
   0xd   :  { %s1844_s28 = smov 0   ;;  %s1846_s29 = smov 0  }
   0xe LB: > { %2458 = sst [smem:[#allocation17_spill]] %s1782_s29  ;;  %s1343_s30 = sadd.s32 4294967295, %s1782_s29   ;;  %s1782_s29 = sphi %s1846_s29, %s28_s29   ;;  %s1778_s28 = sphi %s1844_s28, %s2486_s28   ;;  %s1774_s27 = sphi %s1842_s27, %s2485_s27   ;;  %s1770_s26 = sphi %s1840_s26, %s2484_s26   ;;  %s1766_s25 = sphi %s1838_s25, %s2483_s25   ;;  %s1762_s24 = sphi %s1836_s24, %s2482_s24  }
   0xf   : > { %s1344_s8 = sadd.s32 4294967294, %s1782_s29   ;;  %s49_s9 = sadd.s32 1, %s1770_s26 }
  0x10   : > { %p56_p0 = scmp.ne.s32.totalorder %s1770_s26, %s1766_s25  ;;  %p57_p1 = scmp.eq.s32.totalorder %s1782_s29, 0 }
  0x11   : > { %p62_p2 = scmp.ne.s32.totalorder %s1766_s25, %s1762_s24  ;;  %p1874_p3 = scmp.eq.s32.totalorder %s1343_s30, 0 }
  0x12   : > { %p231_p4 = scmp.eq.s32.totalorder %s1343_s30, 1  ;;  %p1878_p5 = por %p57_p1, %p56_p0 }
  0x13   : > { %s2459_s10 = scalar_select %p1874_p3, 1, 0 }
  0x14   : > { %p237_p6 = scmp.eq.s32.totalorder %s1344_s8, 1  ;;  %p1884_p7 = por %p1874_p3, %p62_p2 }
  0x15   : > { %p1888_p8 = por %p231_p4, %p56_p0  ;;  %p1345_p10 = scmp.ge.s32.totalorder %s1782_s29, 1 }
  0x16   : > { %s2461_s12 = scalar_select %p1884_p7, 1, 0 }
  0x17   : > { %s2462_s13 = scalar_select %p1888_p8, 1, 0 }
  0x18   : > { %p1892_p9 = por %p237_p6, %p62_p2  ;;  %p244_p11 = scmp.lt.s32.totalorder %s1782_s29, 3 }
  0x19   : > { %s2464_s5 = sld [smem:[#allocation21_spill]]  ;;  %p1537_p0 = scmp.lt.s32.totalorder %s1782_s29, 2 }
  0x1a   : > { %s2463_s14 = scalar_select %p1892_p9, 1, 0 }
  0x1b   : > { %p1901_p12 = pnand %p1345_p10, %p244_p11  ;;  %s2466_s6 = sld [smem:[#allocation22_spill]] }
  0x1c   : > { %p1914_p2 = pnand %p1537_p0, %p1878_p5 }
  0x1d   : > { %s2465_s18 = scalar_select %p1901_p12, 1, 0 }
  0x1e   : > { %p1517_p1 = pneg %p1901_p12 }
  0x1f   : > { %s269_s17 = sshll.u32 %s2464_s5, 4  ;;  %s270_s17 = int_to_ptr.vmem [resolvable:$true] %s269_s17 }
  0x20   : > { %s2467_s22 = scalar_select %p1914_p2, 1, 0 }
  0x21   : > { %s280_s21 = sshll.u32 %s2466_s6, 4  ;;  %p1920_p4 = pnand %p1517_p1, %p1874_p3  ;;  %s281_s21 = int_to_ptr.vmem [resolvable:$true] %s280_s21 }
  0x22   : > { %s1598_s30 = scalar_lea.vmem %s270_s17, 128  ;;  %p1606_p9 = scmp.lt.s32.totalorder %s270_s17, %s270_s17 }
  0x23   : > { %p1599_p6 = scmp.ne.s32.totalorder %s270_s17, %s1598_s30  ;;  %p1600_p10 = pneg %p1920_p4 }
  0x24   : > { %p1607_p8 = scmp.lt.s32.totalorder %s1598_s30, %s1598_s30 }
  0x25   : > { %p1601_p11 = pnand %p1600_p10, %p1599_p6 }
  0x26   : > { %p1608_p7 = por %p1607_p8, %p1606_p9 }
  0x27   : > { %p1602_p13 = pneg %p1601_p11 }
  0x29   : > { %p1609_p5 = pnand %p1608_p7, %p1602_p13 }
  0x2b   : > { %1612 = shalt.err (!%p1609_p5)
}
  0x2c   : > { %s1784_s8 = smov [#allocation8]   ;;  %s1613_s11 = scalar_lea.vmem %s281_s21, 16 }
  0x2d   : > { %1520 = dma.vmem_to_smem (!%p1920_p4), %s270_s17, 128, %s1784_s8, [#allocation5]  }
  0x2e   : > { %p1614_p0 = scmp.ne.s32.totalorder %s281_s21, %s1613_s11  ;;  %p1621_p12 = scmp.lt.s32.totalorder %s281_s21, %s281_s21 }
  0x2f   : > { %p1622_p2 = scmp.lt.s32.totalorder %s1613_s11, %s1613_s11 }
  0x30   : > { %p1616_p1 = pnand %p1614_p0, %p1600_p10 }
  0x31   : > { %p1623_p6 = por %p1622_p2, %p1621_p12 }
  0x32   : > { %p1617_p3 = pneg %p1616_p1 }
  0x34   : > { %p1624_p11 = pnand %p1623_p6, %p1617_p3 }
  0x36   : > { %1627 = shalt.err (!%p1624_p11)
}
  0x37   : > { %s1785_s15 = smov [#allocation9]   ;;  %s40_s16 = sadd.s32 1, %s1778_s28 }
  0x38   : > { %1523 = dma.vmem_to_smem (!%p1920_p4), %s281_s21, 16, %s1785_s15, [#allocation10]  }
  0x39   : > { %s1932_s17 = sand.u32 1, %s1770_s26   ;;  %p42_p7 = scmp.ge.s32.totalorder %s40_s16, 2 }
  0x3a   : > { %s1350_s19 = sshll.u32 %s1932_s17, 6  ;;  %s1460_s20 = sshll.u32 %s1778_s28, 10 }
  0x3b   : > { %s2488_s16 = smov (%p42_p7, %s40_s16), 0  ;;  %s2470_s0 = sld [smem:[#allocation20_spill]] }
  0x3c   : > { %2469 = sst [smem:[#allocation18_spill]] %s2488_s16  ;;  %s44_s21 = ssub.s32 %s1778_s28, %s2488_s16 }
  0x3d   : > { %s295_s11 = scalar_lea.vmem [#allocation2], %s1350_s19  ;;  %p47_p3 = scmp.eq.s32.totalorder %s44_s21, 0 }
  0x3e   : > { %s304_s15 = sshll.u32 %s295_s11, 4  ;;  %s292_s6 = scalar_lea.sflag [#allocation3], %s1932_s17  ;;  %s1945_s15 = int_to_ptr.vmem [resolvable:$true] %s304_s15 }
  0x3f   : > { %s1950_s5 = scalar_select %p47_p3, %s1770_s26, %s49_s9  }
  0x40   : > { %p2472_p9 = scmp.ne.s32.totalorder %s2467_s22, 0 }
  0x41   : > { %s1941_s8 = scalar_lea.hbm %s2470_s0, %s1460_s20  ;;  %2471 = sst [smem:[#allocation19_spill]] %s1950_s5 }
  0x42   : > { %s1628_s29 = scalar_lea.hbm %s1941_s8, 1024  ;;  %p1630_p12 = pneg %p2472_p9 }
  0x43   : > { %p1629_p8 = scmp.ne.s32.totalorder %s1941_s8, %s1628_s29  ;;  %s1633_s19 = scalar_lea.hbm %s2470_s0, 2048 }
  0x44   : > { %p1634_p4 = scmp.lt.u32.totalorder %s1941_s8, %s2470_s0  ;;  %p1635_p10 = scmp.lt.u32.totalorder %s1633_s19, %s1628_s29 }
  0x45   : > { %p1631_p13 = pnand %p1630_p12, %p1629_p8  ;;  %p1637_p0 = scmp.lt.u32.totalorder %s1628_s29, %s1941_s8 }
  0x46   : > { %p1636_p5 = por %p1635_p10, %p1634_p4 }
  0x47   : > { %p1632_p2 = pneg %p1631_p13 }
  0x48   : > { %p1638_p1 = por %p1637_p0, %p1636_p5 }
  0x4a   : > { %p1639_p6 = pnand %p1638_p1, %p1632_p2 }
  0x4c   : > { %1642 = shalt.err (!%p1639_p6)
}
  0x4d   : > { %s1643_s9 = scalar_lea.vmem %s1945_s15, 1024  ;;  %s1786_s11 = smov [#allocation2]  }
  0x4e   : > { %p1644_p11 = scmp.ne.s32.totalorder %s1945_s15, %s1643_s9  ;;  %s1648_s20 = sshll.u32 %s1786_s11, 4  ;;  %s1649_s20 = int_to_ptr.vmem [resolvable:$false] %s1648_s20 }
  0x4f   : > { %s1650_s23 = scalar_lea.vmem %s1649_s20, 2048  ;;  %p1651_p8 = scmp.lt.s32.totalorder %s1945_s15, %s1649_s20 }
  0x50   : > { %p1646_p7 = pnand %p1644_p11, %p1630_p12  ;;  %p1652_p13 = scmp.lt.s32.totalorder %s1650_s23, %s1643_s9 }
  0x52   : > { %p1647_p3 = pneg %p1646_p7  ;;  %p1653_p4 = por %p1652_p13, %p1651_p8 }
  0x54   : > { %p1654_p10 = pnand %p1653_p4, %p1647_p3 }
  0x56   : > { %1657 = shalt.err (!%p1654_p10)
}
  0x57   : > { %s1787_s29 = smov 128   ;;  %s1788_s19 = smov 8  }
  0x58   : > { %1527 = dma.hbm_to_vmem [thread:$0]  (!%p2472_p9), %s1941_s8, 1024, %s1945_s15, %s292_s6, %s1787_s29, %s1787_s29, %s1788_s19  }
  0x59   : > { %s1353_s30 = sshll.u32 %s1932_s17, 3  ;;  %s1354_s21 = sshll.u32 %s1778_s28, 7 }
  0x5a   : > { %s1985_s20 = scalar_lea.hbm %s2440_s2, %s1354_s21  ;;  %s331_s23 = scalar_lea.vmem [#allocation6], %s1353_s30 }
  0x5b   : > { %s338_s0 = sshll.u32 %s331_s23, 4  ;;  %s328_s16 = scalar_lea.sflag [#allocation7], %s1932_s17  ;;  %s339_s0 = int_to_ptr.vmem [resolvable:$true] %s338_s0 }
  0x5c   : > { %s1658_s5 = scalar_lea.hbm %s1985_s20, 128  ;;  %s1663_s15 = scalar_lea.hbm %s2440_s2, 256 }
  0x5d   : > { %p1659_p2 = scmp.ne.s32.totalorder %s1985_s20, %s1658_s5  ;;  %p1664_p1 = scmp.lt.u32.totalorder %s1985_s20, %s2440_s2 }
  0x5e   : > { %p1665_p6 = scmp.lt.u32.totalorder %s1663_s15, %s1658_s5  ;;  %p1667_p7 = scmp.lt.u32.totalorder %s1658_s5, %s1985_s20 }
  0x5f   : > { %p1661_p5 = pnand %p1659_p2, %p1630_p12 }
  0x60   : > { %p1666_p11 = por %p1665_p6, %p1664_p1 }
  0x61   : > { %p1662_p0 = pneg %p1661_p5 }
  0x62   : > { %p1668_p3 = por %p1667_p7, %p1666_p11 }
  0x64   : > { %p1669_p8 = pnand %p1668_p3, %p1662_p0 }
  0x66   : > { %1672 = shalt.err (!%p1669_p8)
}
  0x67   : > { %s1673_s17 = scalar_lea.vmem %s339_s0, 128  ;;  %s1789_s30 = smov [#allocation6]  }
  0x68   : > { %p1674_p13 = scmp.ne.s32.totalorder %s339_s0, %s1673_s17  ;;  %s1678_s21 = sshll.u32 %s1789_s30, 4  ;;  %s1679_s21 = int_to_ptr.vmem [resolvable:$false] %s1678_s21 }
  0x69   : > { %s1680_s11 = scalar_lea.vmem %s1679_s21, 256  ;;  %p1681_p2 = scmp.lt.s32.totalorder %s339_s0, %s1679_s21 }
  0x6a   : > { %p1676_p4 = pnand %p1674_p13, %p1630_p12  ;;  %p1682_p5 = scmp.lt.s32.totalorder %s1680_s11, %s1673_s17 }
  0x6c   : > { %p1677_p10 = pneg %p1676_p4  ;;  %p1683_p1 = por %p1682_p5, %p1681_p2 }
  0x6e   : > { %p1684_p6 = pnand %p1683_p1, %p1677_p10 }
  0x70   : > { %1687 = shalt.err (!%p1684_p6)
}
  0x71   : > { %1530 = dma.hbm_to_vmem [thread:$0]  (!%p2472_p9), %s1985_s20, 128, %s339_s0, %s328_s16  }
  0x72   : > { %p2473_p0 = scmp.ne.s32.totalorder %s2465_s18, 0 }
  0x73   : > { %s2010_s5 = sand.u32 (!%p2473_p0), 1, %s1766_s25   ;;  %p2474_p12 = scmp.ne.s32.totalorder (!%p2473_p0), %s2461_s12, 0 }
  0x74   : > { %347 = sbr.rel (%p2473_p0) target bundleno = 731 (0x2db), region = 48  ;;  %s1356_s9 = sshll.u32 (!%p2473_p0), %s2010_s5, 6 }
  0x75   : > { %s350_s23 = scalar_lea.sflag (!%p2473_p0), [#allocation3], %s2010_s5  ;;  %s2016_s6 = scalar_lea.vmem (!%p2473_p0), [#allocation2], %s1356_s9 }
  0x7b   : > { %1741 = dma.done.wait (%p2474_p12), %s350_s23, 1024  }
  0x7c   : > { %1743 = vsyncadd (%p2474_p12), %s350_s23, 4294966272  ;;  %s1357_s0 = sshll.u32 %s2010_s5, 3  ;;  %s359_s18 = scalar_lea.sflag [#allocation7], %s2010_s5 }
  0x7d   : > { %s362_s22 = scalar_lea.vmem [#allocation6], %s1357_s0 }
  0x7e   : > { %1745 = dma.done.wait (%p2474_p12), %s359_s18, 128  }
  0x7f   : > { %1747 = vsyncadd (%p2474_p12), %s359_s18, 4294967168  ;;  %p2475_p9 = scmp.ne.s32.totalorder %s2459_s10, 0 }
  0x81   : > { %1749 = dma.done.wait (%p2475_p9), [#allocation5], 128  }
  0x82   : > { %1751 = vsyncadd (%p2475_p9), [#allocation5], 4294967168 }
  0x83   : > { %1753 = dma.done.wait (%p2475_p9), [#allocation10], 16  }
  0x84   : > { %1755 = vsyncadd (%p2475_p9), [#allocation10], 4294967280 }
  0x85   : > { %375 = sfence }
  0x86   : > { %v446_v0 = vld [vmem:[%s362_s22] sm:$0xff]  ;;  %vm447_vm0 = vcmask 64512   ;;  %s1790_s29 = smov 112   ;;  %s1791_s19 = smov 120   ;;  %vm634_vm1 = vcmask 130048  }
  0x87   : > { %v444_v1 = vld [vmem:[%s2441_s3] sm:$0xff]  ;;  %v445_v2 = vld [vmem:[%s2441_s3 + $0x8] sm:$0xff]  ;;  %1478 = vmatprep.subr.mxu0 %v446_v0  ;;  %s1792_s17 = smov 104   ;;  %p423_p11 = scmp.lt.s32.totalorder %s1774_s27, 1 }
  0x88   : > { %1480 = vmatprep.mubr.msk.f32.mxu0 %vm447_vm0, %v444_v1  ;;  %1479 = vmatpush3.msra.mxu0 %v446_v0  ;;  %v443_v3 = vld [vmem:[%s2442_s4] sm:$0xff]  ;;  %s2060_s18 = sld [smem:[#allocation8 + $0x200]]  ;;  %s2062_s22 = sld [smem:[#allocation8 + $0x201]]  ;;  %v611_v13 = vld [vmem:[%s2016_s6 + $0x8] sm:$0xff] }
  0x89   : > { %1481 = vmatmul.mubr.msk.f32.vlgmr.msra.gmra.mrb[0].mxu0 %vm447_vm0, %v445_v2  ;;  %1483 = vmatprep.subr.mxu1 %v443_v3  ;;  %s424_s30 = scalar_select %p423_p11, %s1774_s27, 1  ;;  %v610_v15 = vld [vmem:[%s2016_s6] sm:$0xff] }
  0x8a   : > { %1488 = vmatprep.subr.mxu0 %v443_v3  ;;  %1484 = vmatpush3.msra.mxu1 %v443_v3  ;;  %s2064_s16 = sld [smem:[#allocation8 + $0x202]]  ;;  %s2066_s20 = sld [smem:[#allocation8]] }
  0x8b   : > { %1489 = vmatpush3.msra.mxu0 %v443_v3  ;;  %1493 = vmatprep.subr.mxu1 %v443_v3  ;;  %s1461_s21 = sshll.u32 %s424_s30, 4  ;;  %s2068_s12 = sld [smem:[#allocation8 + $0x203]] }
  0x8c   : > { %1498 = vmatprep.subr.mxu0 %v443_v3  ;;  %s430_s0 = scalar_lea.vmem %s2439_s1, %s1461_s21  ;;  %s2070_s8 = sld [smem:[#allocation8 + $0x1]] }
  0x8d   : > { %s2072_s15 = sld [smem:[#allocation8 + $0x2]]  ;;  %s2074_s10 = sld [smem:[#allocation9]]  ;;  %v2080_v12 = vld [vmem:[%s430_s0 + $0x8] sm:$0xff]  ;;  %v2087_v14 = vld [vmem:[%s430_s0] sm:$0xff] }
  0x8e   : > { %s2085_s30 = sld [smem:[#allocation9 + $0x3]]  ;;  %v2091_v16 = vsub.f32 1.0, %v2080_v12  ;;  %v617_v17 = vmul.f32 %v611_v13, %v2080_v12  ;;  %v625_v18 = vstv %s2060_s18  ;;  %v2096_v19 = vsub.f32 1.0, %v2087_v14  ;;  %s2114_s21 = scalar_lea.vmem [#allocation11], %s1356_s9 }
  0x8f   : > { %v616_v20 = vmul.f32 %v610_v15, %v2087_v14  ;;  %v642_v22 = vstv %s2062_s22  ;;  %s2132_s9 = sld [smem:[#allocation8 + $0x80]]  ;;  %s2136_s23 = sld [smem:[#allocation8 + $0x281]] }
  0x90   : > { %v621_v21 = vstv %s2066_s20  ;;  %v659_v23 = vstv %s2064_s16  ;;  %s2134_s11 = sld [smem:[#allocation8 + $0x280]]  ;;  %s2138_s0 = sld [smem:[#allocation8 + $0x282]] }
  0x91   : > { %v676_v24 = vstv %s2068_s12  ;;  %s2140_s18 = sld [smem:[#allocation8 + $0x81]]  ;;  %s2142_s22 = sld [smem:[#allocation8 + $0x82]] }
  0x92   : > { %v638_v27 = vstv %s2070_s8  ;;  %s2144_s16 = sld [smem:[#allocation8 + $0x83]]  ;;  %s2148_s12 = sld [smem:[#allocation8 + $0x100]] }
  0x93   : > { %v631_v26 = vstv %s2074_s10  ;;  %v655_v28 = vstv %s2072_s15  ;;  %s2146_s20 = sld [smem:[#allocation8 + $0x283]]  ;;  %s2150_s8 = sld [smem:[#allocation8 + $0x300]] }
  0x94   : > { %v682_v35 = vstv %s2085_s30  ;;  %s2152_s15 = sld [smem:[#allocation8 + $0x101]]  ;;  %s2163_s30 = sld [smem:[#allocation8 + $0x303]] }
  0x95   : > { %s2154_s10 = sld [smem:[#allocation8 + $0x301]]  ;;  %p2476_p3 = scmp.ne.s32.totalorder %s2462_s13, 0 }
 0x15c   : > { %v1482_v4 = vpop.f32.mrb[0].mxu0 }
 0x15d   : > { %v520_v5 = vpop.f32.mrb[1].mxu0 }
 0x15e   : > { %846 = vrot.lane.b32.xlu1 %v520_v5, %s1790_s29  ;;  %688 = vrot.lane.b32.xlu0 %v520_v5, %s1791_s19 }
 0x15f   : > { %1485 = vmatprep.mubr.msk.f32.mxu1 %vm447_vm0, %v520_v5 }
 0x160   : > { %1486 = vmatmul.mubr.msk.f32.vlgmr.msra.gmra.mrb[0].mxu1 %vm447_vm0, %v1482_v4 }
 0x161   : > { %1494 = vmatpush3.msra.mxu1 %v443_v3 }
 0x162   : > { %848 = vrot.lane.b32.xlu1 %v1482_v4, %s1790_s29  ;;  %690 = vrot.lane.b32.xlu0 %v1482_v4, %s1791_s19  ;;  %s2076_s29 = sld [smem:[#allocation8 + $0x3]]  ;;  %s2078_s19 = sld [smem:[#allocation9 + $0x1]] }
 0x166   : > { %1006 = vrot.lane.b32.xlu1 %v1482_v4, %s1792_s17  ;;  %1004 = vrot.lane.b32.xlu0 %v520_v5, %s1792_s17  ;;  %s2083_s17 = sld [smem:[#allocation9 + $0x2]] }
 0x168   : > { %v672_v29 = vstv %s2076_s29  ;;  %v648_v32 = vstv %s2078_s19  ;;  %s2156_s29 = sld [smem:[#allocation8 + $0x102]] }
 0x169   : > { %s2158_s19 = sld [smem:[#allocation8 + $0x302]] }
 0x16c   : > { %v665_v34 = vstv %s2083_s17  ;;  %s2161_s17 = sld [smem:[#allocation8 + $0x103]] }
 0x1d0   : > { %v847_v6 = vpop.permute.xlu1 %846  ;;  %v689_v7 = vpop.permute.xlu0 %688 }
 0x1d1   : > { %1490 = vmatprep.mubr.msk.f32.mxu0 %vm447_vm0, %v689_v7  ;;  %1495 = vmatprep.mubr.msk.f32.mxu1 %vm447_vm0, %v847_v6 }
 0x1d4   : > { %v849_v8 = vpop.permute.xlu1 %848  ;;  %v691_v9 = vpop.permute.xlu0 %690 }
 0x1d5   : > { %1491 = vmatmul.mubr.msk.f32.vlgmr.msra.gmra.mrb[2].mxu0 %vm447_vm0, %v691_v9  ;;  %1496 = vmatmul.mubr.msk.f32.vlgmr.msra.gmra.mrb[2].mxu1 %vm447_vm0, %v849_v8  ;;  %v1386_v8 = vld [vmem:[%s2016_s6 + $0x18] sm:$0xff]  ;;  %v1410_v9 = vld [vmem:[%s2016_s6 + $0x28] sm:$0xff] }
 0x1d6   : > { %1499 = vmatpush3.msra.mxu0 %v443_v3 }
 0x1d8   : > { %v1007_v10 = vpop.permute.xlu1 %1006  ;;  %v1005_v11 = vpop.permute.xlu0 %1004 }
 0x1d9   : > { %1500 = vmatprep.mubr.msk.f32.mxu0 %vm447_vm0, %v1005_v11  ;;  %v2168_v11 = vld [vmem:[%s2016_s6 + $0x20] sm:$0xff] }
 0x1da   : > { %1501 = vmatmul.mubr.msk.f32.vlgmr.msra.gmra.mrb[4].mxu0 %vm447_vm0, %v1007_v10  ;;  %v1385_v10 = vld [vmem:[%s2016_s6 + $0x10] sm:$0xff] }
 0x233   : > { %v1487_v25 = vpop.f32.mrb[0].mxu1 }
 0x234   : > { %v613_v30 = vmul.f32 %v1487_v25, %v2091_v16  ;;  %v619_v31 = vadd.f32 %v1487_v25, %v617_v17  ;;  %v601_v33 = vpop.f32.mrb[1].mxu1  ;;  %v787_v17 = vstv %s2134_s11  ;;  %v2181_v25 = vld [vmem:[%s2016_s6 + $0x38] sm:$0xff]  ;;  %s2212_s11 = sld [smem:[#allocation8 + $0x181]] }
 0x235   : > { %v612_v36 = vmul.f32 %v601_v33, %v2096_v19  ;;  %v618_v37 = vadd.f32 %v616_v20, %v601_v33  ;;  %v778_v20 = vmul.f32 %v1385_v10, %v2087_v14  ;;  %v973_v33 = vstv %s2156_s29 }
 0x236   : > { %v615_v38 = vadd.f32 %v613_v30, %v611_v13  ;;  %v627_v39 = vmul.f32 %v625_v18, %v619_v31  ;;  %v644_v40 = vmul.f32 %v642_v22, %v619_v31  ;;  %v661_v41 = vmul.f32 %v659_v23, %v619_v31 }
 0x237   : > { %v678_v42 = vmul.f32 %v676_v24, %v619_v31  ;;  %v614_v43 = vadd.f32 %v612_v36, %v610_v15  ;;  %v626_v44 = vmul.f32 %v625_v18, %v618_v37  ;;  %v643_v45 = vmul.f32 %v642_v22, %v618_v37 }
 0x238   : > { %v623_v46 = vmul.f32 %v621_v21, %v615_v38  ;;  %v640_v47 = vmul.f32 %v638_v27, %v615_v38  ;;  %v657_v48 = vmul.f32 %v655_v28, %v615_v38  ;;  %v674_v49 = vmul.f32 %v672_v29, %v615_v38 }
 0x239   : > { %v622_v50 = vmul.f32 %v621_v21, %v614_v43  ;;  %v639_v51 = vmul.f32 %v638_v27, %v614_v43  ;;  %v656_v52 = vmul.f32 %v655_v28, %v614_v43  ;;  %v660_v53 = vmul.f32 %v659_v23, %v618_v37 }
 0x23a   : > { %v629_v54 = vadd.f32 %v627_v39, %v623_v46  ;;  %v646_v55 = vadd.f32 %v644_v40, %v640_v47  ;;  %v663_v56 = vadd.f32 %v661_v41, %v657_v48  ;;  %v680_v57 = vadd.f32 %v678_v42, %v674_v49 }
 0x23b   : > { %v628_v58 = vadd.f32 %v626_v44, %v622_v50  ;;  %v645_v59 = vadd.f32 %v643_v45, %v639_v51  ;;  %v662_v60 = vadd.f32 %v660_v53, %v656_v52  ;;  %v673_v61 = vmul.f32 %v672_v29, %v614_v43 }
 0x23c   : > { %v633_v62 = vadd.f32 %v631_v26, %v629_v54  ;;  %v650_v63 = vadd.f32 %v648_v32, %v646_v55  ;;  %v667_v0 = vadd.f32 %v665_v34, %v663_v56  ;;  %v684_v1 = vadd.f32 %v682_v35, %v680_v57 }
 0x23d   : > { %v632_v2 = vadd.f32 %v631_v26, %v628_v58  ;;  %v649_v3 = vadd.f32 %v648_v32, %v645_v59  ;;  %v666_v4 = vadd.f32 %v665_v34, %v662_v60  ;;  %v677_v5 = vmul.f32 %v676_v24, %v618_v37 }
 0x23e   : > { %636 = vst.msk [vmem:[%s2114_s21 + $0x8] sm:$0xff] %vm634_vm1, %v633_v62  ;;  %1372 = vst.msk [vmem:[%s2114_s21 + $0x18] sm:$0xff] %vm634_vm1, %v650_v63  ;;  %v779_v13 = vmul.f32 %v1386_v8, %v2080_v12  ;;  %v783_v15 = vstv %s2132_s9  ;;  %v937_v18 = vmul.f32 %v1410_v9, %v2080_v12  ;;  %v799_v21 = vstv %s2140_s18  ;;  %s2206_s9 = sld [smem:[#allocation8 + $0x180]]  ;;  %s2282_s18 = sld [smem:[#allocation8 + $0x382]] }
 0x23f   : > { %1377 = vst.msk [vmem:[%s2114_s21 + $0x28] sm:$0xff] %vm634_vm1, %v667_v0  ;;  %1382 = vst.msk [vmem:[%s2114_s21 + $0x38] sm:$0xff] %vm634_vm1, %v684_v1  ;;  %v679_v6 = vadd.f32 %v677_v5, %v673_v61  ;;  %v803_v22 = vstv %s2136_s23  ;;  %v819_v23 = vstv %s2138_s0  ;;  %v936_v24 = vmul.f32 %v2168_v11, %v2087_v14  ;;  %s2222_s23 = sld [smem:[#allocation8 + $0x182]]  ;;  %s2270_s0 = sld [smem:[#allocation8 + $0x381]] }
 0x240   : > { %635 = vst.msk [vmem:[%s2114_s21] sm:$0xff] %vm634_vm1, %v632_v2  ;;  %1371 = vst.msk [vmem:[%s2114_s21 + $0x10] sm:$0xff] %vm634_vm1, %v649_v3  ;;  %v815_v26 = vstv %s2142_s22  ;;  %v831_v27 = vstv %s2144_s16  ;;  %v2196_v39 = vmul.f32 %v2181_v25, %v2080_v12  ;;  %s2291_s22 = sld [smem:[#allocation8 + $0x183]] }
 0x241   : > { %1376 = vst.msk [vmem:[%s2114_s21 + $0x20] sm:$0xff] %vm634_vm1, %v666_v4  ;;  %v683_v7 = vadd.f32 %v682_v35, %v679_v6  ;;  %v835_v28 = vstv %s2146_s20  ;;  %v941_v29 = vstv %s2148_s12  ;;  %v945_v30 = vstv %s2150_s8  ;;  %s2301_s16 = sld [smem:[#allocation8 + $0x383]]  ;;  %s1462_s20 = sshll.u32 %s1774_s27, 10 }
 0x242   : > { %v957_v31 = vstv %s2152_s15  ;;  %v961_v32 = vstv %s2154_s10  ;;  %v977_v36 = vstv %s2158_s19  ;;  %v989_v37 = vstv %s2161_s17  ;;  %s1178_s12 = sshll.u32 %s2114_s21, 4  ;;  %s2383_s15 = scalar_lea.hbm %s2445_s7, %s1462_s20  ;;  %s2385_s12 = int_to_ptr.vmem [resolvable:$true] %s1178_s12 }
 0x243   : > { %1381 = vst.msk [vmem:[%s2114_s21 + $0x30] sm:$0xff] %vm634_vm1, %v683_v7  ;;  %v993_v38 = vstv %s2163_s30  ;;  %s1163_s10 = scalar_lea.sflag [#allocation4], %s2010_s5  ;;  %s1688_s29 = scalar_lea.vmem %s2385_s12, 1024 }
 0x244   : > { %p1689_p7 = scmp.ne.s32.totalorder %s2385_s12, %s1688_s29  ;;  %s1793_s19 = smov [#allocation11]  }
 0x245   : > { %v793_v4 = vld [vmem:[%s2114_s21 + $0x8] sm:$0xff]  ;;  %s1692_s17 = sshll.u32 %s1793_s19, 4  ;;  %s1693_s17 = int_to_ptr.vmem [resolvable:$false] %s1692_s17 }
 0x246   : > { %p1690_p8 = pnand %p1689_p7, %p2476_p3  ;;  %s1694_s30 = scalar_lea.vmem %s1693_s17, 2048 }
 0x247   : > { %p1695_p4 = scmp.lt.s32.totalorder %s2385_s12, %s1693_s17  ;;  %p1696_p10 = scmp.lt.s32.totalorder %s1694_s30, %s1688_s29 }
 0x248   : > { %p1691_p13 = pneg %p1690_p8 }
 0x249   : > { %p1697_p2 = por %p1696_p10, %p1695_p4 }
 0x24b   : > { %p1698_p5 = pnand %p1697_p2, %p1691_p13 }
 0x2a8   : > { %v1492_v34 = vpop.f32.mrb[2].mxu0  ;;  %v1497_v35 = vpop.f32.mrb[2].mxu1 }
 0x2a9   : > { %v775_v40 = vmul.f32 %v1492_v34, %v2091_v16  ;;  %v781_v41 = vadd.f32 %v1492_v34, %v779_v13  ;;  %v933_v42 = vmul.f32 %v1497_v35, %v2091_v16  ;;  %v2200_v43 = vadd.f32 %v1497_v35, %v937_v18  ;;  %v762_v44 = vpop.f32.mrb[3].mxu0  ;;  %v920_v45 = vpop.f32.mrb[3].mxu1  ;;  %v1404_v13 = vld [vmem:[%s2114_s21 + $0x38] sm:$0xff]  ;;  %v792_v34 = vld [vmem:[%s2114_s21] sm:$0xff]  ;;  %v1391_v35 = vld [vmem:[%s2114_s21 + $0x10] sm:$0xff] }
 0x2aa   : > { %v774_v46 = vmul.f32 %v762_v44, %v2096_v19  ;;  %v780_v47 = vadd.f32 %v778_v20, %v762_v44  ;;  %v932_v48 = vmul.f32 %v920_v45, %v2096_v19  ;;  %v2204_v49 = vadd.f32 %v936_v24, %v920_v45 }
 0x2ab   : > { %v777_v50 = vadd.f32 %v1386_v8, %v775_v40  ;;  %v789_v12 = vmul.f32 %v787_v17, %v781_v41  ;;  %v805_v51 = vmul.f32 %v803_v22, %v781_v41  ;;  %v821_v52 = vmul.f32 %v819_v23, %v781_v41  ;;  %v2220_v8 = vld [vmem:[%s2016_s6 + $0x30] sm:$0xff]  ;;  %s2268_s6 = sld [smem:[#allocation8 + $0x380]] }
 0x2ac   : > { %v837_v53 = vmul.f32 %v835_v28, %v781_v41  ;;  %v2210_v54 = vadd.f32 %v1410_v9, %v933_v42  ;;  %v776_v55 = vadd.f32 %v1385_v10, %v774_v46  ;;  %v788_v56 = vmul.f32 %v787_v17, %v780_v47  ;;  %v1392_v9 = vld [vmem:[%s2114_s21 + $0x18] sm:$0xff]  ;;  %v1398_v10 = vld [vmem:[%s2114_s21 + $0x28] sm:$0xff] }
 0x2ad   : > { %v785_v57 = vmul.f32 %v783_v15, %v777_v50  ;;  %v801_v58 = vmul.f32 %v799_v21, %v777_v50  ;;  %v817_v59 = vmul.f32 %v815_v26, %v777_v50  ;;  %v833_v60 = vmul.f32 %v831_v27, %v777_v50  ;;  %v2214_v61 = vpop.f32.mrb[4].mxu0 }
 0x2ae   : > { %v784_v62 = vmul.f32 %v783_v15, %v776_v55  ;;  %v800_v63 = vmul.f32 %v799_v21, %v776_v55  ;;  %v804_v0 = vmul.f32 %v803_v22, %v780_v47  ;;  %v816_v1 = vmul.f32 %v815_v26, %v776_v55  ;;  %v2216_v2 = vpop.f32.mrb[5].mxu0 }
 0x2af   : > { %v791_v3 = vadd.f32 %v789_v12, %v785_v57  ;;  %v807_v5 = vadd.f32 %v805_v51, %v801_v58  ;;  %v823_v6 = vadd.f32 %v821_v52, %v817_v59  ;;  %v839_v7 = vadd.f32 %v837_v53, %v833_v60  ;;  %v1403_v12 = vld [vmem:[%s2114_s21 + $0x30] sm:$0xff] }
 0x2b0   : > { %v790_v15 = vadd.f32 %v788_v56, %v784_v62  ;;  %v806_v17 = vadd.f32 %v804_v0, %v800_v63  ;;  %v820_v18 = vmul.f32 %v819_v23, %v780_v47  ;;  %v832_v20 = vmul.f32 %v831_v27, %v776_v55  ;;  %v1397_v23 = vld [vmem:[%s2114_s21 + $0x20] sm:$0xff] }
 0x2b1   : > { %v795_v21 = vadd.f32 %v793_v4, %v791_v3  ;;  %v811_v22 = vadd.f32 %v1392_v9, %v807_v5  ;;  %v827_v24 = vadd.f32 %v1398_v10, %v823_v6  ;;  %v843_v26 = vadd.f32 %v1404_v13, %v839_v7 }
 0x2b2   : > { %v794_v40 = vadd.f32 %v792_v34, %v790_v15  ;;  %v810_v41 = vadd.f32 %v1391_v35, %v806_v17  ;;  %v822_v42 = vadd.f32 %v820_v18, %v816_v1  ;;  %v836_v44 = vmul.f32 %v835_v28, %v780_v47 }
 0x2b3   : > { %797 = vst.msk [vmem:[%s2114_s21 + $0x8] sm:$0xff] %vm634_vm1, %v795_v21  ;;  %1394 = vst.msk [vmem:[%s2114_s21 + $0x18] sm:$0xff] %vm634_vm1, %v811_v22  ;;  %v934_v27 = vadd.f32 %v2168_v11, %v932_v48  ;;  %v943_v45 = vmul.f32 %v941_v29, %v2210_v54  ;;  %v2246_v28 = vmul.f32 %v2220_v8, %v2087_v14  ;;  %v1099_v46 = vstv %s2206_s9 }
 0x2b4   : > { %1400 = vst.msk [vmem:[%s2114_s21 + $0x28] sm:$0xff] %vm634_vm1, %v827_v24  ;;  %1406 = vst.msk [vmem:[%s2114_s21 + $0x38] sm:$0xff] %vm634_vm1, %v843_v26  ;;  %v826_v47 = vadd.f32 %v1397_v23, %v822_v42  ;;  %v838_v50 = vadd.f32 %v836_v44, %v832_v20  ;;  %v946_v11 = vmul.f32 %v945_v30, %v2204_v49  ;;  %v1115_v48 = vstv %s2212_s11 }
 0x2b5   : > { %796 = vst.msk [vmem:[%s2114_s21] sm:$0xff] %vm634_vm1, %v794_v40  ;;  %1393 = vst.msk [vmem:[%s2114_s21 + $0x10] sm:$0xff] %vm634_vm1, %v810_v41  ;;  %v942_v14 = vmul.f32 %v941_v29, %v934_v27  ;;  %v947_v51 = vmul.f32 %v945_v30, %v2200_v43  ;;  %v958_v52 = vmul.f32 %v957_v31, %v934_v27  ;;  %v1131_v59 = vstv %s2222_s23 }
 0x2b6   : > { %v959_v53 = vmul.f32 %v957_v31, %v2210_v54  ;;  %1399 = vst.msk [vmem:[%s2114_s21 + $0x20] sm:$0xff] %vm634_vm1, %v826_v47  ;;  %v842_v55 = vadd.f32 %v1403_v12, %v838_v50  ;;  %v962_v29 = vmul.f32 %v961_v32, %v2204_v49  ;;  %v974_v30 = vmul.f32 %v973_v33, %v934_v27 }
 0x2b7   : > { %v975_v56 = vmul.f32 %v973_v33, %v2210_v54  ;;  %v949_v31 = vadd.f32 %v947_v51, %v943_v45  ;;  %v963_v57 = vmul.f32 %v961_v32, %v2200_v43  ;;  %v979_v58 = vmul.f32 %v977_v36, %v2200_v43 }
 0x2b8   : > { %1405 = vst.msk [vmem:[%s2114_s21 + $0x30] sm:$0xff] %vm634_vm1, %v842_v55  ;;  %v948_v33 = vadd.f32 %v946_v11, %v942_v14  ;;  %v964_v60 = vadd.f32 %v962_v29, %v958_v52  ;;  %v978_v62 = vmul.f32 %v977_v36, %v2204_v49  ;;  %v991_v32 = vmul.f32 %v989_v37, %v2210_v54 }
 0x2b9   : > { %v965_v63 = vadd.f32 %v963_v57, %v959_v53  ;;  %v981_v0 = vadd.f32 %v979_v58, %v975_v56  ;;  %v995_v1 = vmul.f32 %v993_v38, %v2200_v43  ;;  %v1091_v3 = vmul.f32 %v2214_v61, %v2091_v16 }
 0x2ba   : > { %v951_v4 = vld [vmem:[%s2114_s21 + $0x8] sm:$0xff]  ;;  %v1416_v5 = vld [vmem:[%s2114_s21 + $0x18] sm:$0xff]  ;;  %v980_v6 = vadd.f32 %v978_v62, %v974_v30  ;;  %v990_v7 = vmul.f32 %v989_v37, %v934_v27  ;;  %v994_v54 = vmul.f32 %v993_v38, %v2204_v49  ;;  %v1090_v9 = vmul.f32 %v2216_v2, %v2096_v19 }
 0x2bb   : > { %v1422_v36 = vld [vmem:[%s2114_s21 + $0x28] sm:$0xff]  ;;  %v953_v10 = vadd.f32 %v951_v4, %v949_v31  ;;  %v969_v13 = vadd.f32 %v1416_v5, %v965_v63  ;;  %v997_v17 = vadd.f32 %v995_v1, %v991_v32  ;;  %v1428_v18 = vld [vmem:[%s2114_s21 + $0x38] sm:$0xff]  ;;  %v1093_v38 = vadd.f32 %v2181_v25, %v1091_v3 }
 0x2bc   : > { %v950_v43 = vld [vmem:[%s2114_s21] sm:$0xff]  ;;  %v1415_v16 = vld [vmem:[%s2114_s21 + $0x10] sm:$0xff]  ;;  %v985_v15 = vadd.f32 %v1422_v36, %v981_v0  ;;  %v1092_v49 = vadd.f32 %v2220_v8, %v1090_v9  ;;  %v1097_v22 = vadd.f32 %v2214_v61, %v2196_v39  ;;  %v1103_v25 = vstv %s2268_s6 }
 0x2bd   : > { %v952_v37 = vadd.f32 %v950_v43, %v948_v33  ;;  %v968_v20 = vadd.f32 %v1415_v16, %v964_v60  ;;  %955 = vst.msk [vmem:[%s2114_s21 + $0x8] sm:$0xff] %vm634_vm1, %v953_v10  ;;  %1418 = vst.msk [vmem:[%s2114_s21 + $0x18] sm:$0xff] %vm634_vm1, %v969_v13  ;;  %v1421_v19 = vld [vmem:[%s2114_s21 + $0x20] sm:$0xff]  ;;  %v1001_v21 = vadd.f32 %v1428_v18, %v997_v17  ;;  %v1119_v24 = vstv %s2270_s0 }
 0x2be   : > { %1424 = vst.msk [vmem:[%s2114_s21 + $0x28] sm:$0xff] %vm634_vm1, %v985_v15  ;;  %v984_v8 = vadd.f32 %v1421_v19, %v980_v6  ;;  %v996_v26 = vadd.f32 %v994_v54, %v990_v7  ;;  %v1096_v34 = vadd.f32 %v2246_v28, %v2216_v2  ;;  %v1135_v35 = vstv %s2282_s18 }
 0x2bf   : > { %954 = vst.msk [vmem:[%s2114_s21] sm:$0xff] %vm634_vm1, %v952_v37  ;;  %1417 = vst.msk [vmem:[%s2114_s21 + $0x10] sm:$0xff] %vm634_vm1, %v968_v20  ;;  %v1427_v40 = vld [vmem:[%s2114_s21 + $0x30] sm:$0xff]  ;;  %v1101_v39 = vmul.f32 %v1099_v46, %v1093_v38  ;;  %v1117_v61 = vmul.f32 %v1115_v48, %v1093_v38  ;;  %v1133_v41 = vmul.f32 %v1131_v59, %v1093_v38  ;;  %v1147_v42 = vstv %s2291_s22 }
 0x2c0   : > { %1430 = vst.msk [vmem:[%s2114_s21 + $0x38] sm:$0xff] %vm634_vm1, %v1001_v21  ;;  %1423 = vst.msk [vmem:[%s2114_s21 + $0x20] sm:$0xff] %vm634_vm1, %v984_v8  ;;  %v1000_v44 = vadd.f32 %v1427_v40, %v996_v26  ;;  %v1100_v23 = vmul.f32 %v1099_v46, %v1092_v49  ;;  %v1116_v27 = vmul.f32 %v1115_v48, %v1092_v49  ;;  %v1151_v2 = vstv %s2301_s16 }
 0x2c1   : > { %v1105_v45 = vmul.f32 %v1103_v25, %v1097_v22  ;;  %v1121_v28 = vmul.f32 %v1119_v24, %v1097_v22  ;;  %v1137_v47 = vmul.f32 %v1135_v35, %v1097_v22  ;;  %v1104_v50 = vmul.f32 %v1103_v25, %v1096_v34 }
 0x2c2   : > { %1429 = vst.msk [vmem:[%s2114_s21 + $0x30] sm:$0xff] %vm634_vm1, %v1000_v44  ;;  %v1120_v11 = vmul.f32 %v1119_v24, %v1096_v34  ;;  %v1132_v12 = vmul.f32 %v1131_v59, %v1092_v49  ;;  %v1149_v14 = vmul.f32 %v1147_v42, %v1093_v38  ;;  %v1153_v53 = vmul.f32 %v1151_v2, %v1097_v22 }
 0x2c3   : > { %v1107_v51 = vadd.f32 %v1105_v45, %v1101_v39  ;;  %v1123_v52 = vadd.f32 %v1121_v28, %v1117_v61  ;;  %v1139_v46 = vadd.f32 %v1137_v47, %v1133_v41  ;;  %v1106_v55 = vadd.f32 %v1104_v50, %v1100_v23 }
 0x2c4   : > { %v1109_v48 = vld [vmem:[%s2114_s21 + $0x8] sm:$0xff]  ;;  %v1122_v29 = vadd.f32 %v1120_v11, %v1116_v27  ;;  %v1440_v30 = vld [vmem:[%s2114_s21 + $0x18] sm:$0xff]  ;;  %v1136_v56 = vmul.f32 %v1135_v35, %v1096_v34  ;;  %v1148_v57 = vmul.f32 %v1147_v42, %v1092_v49  ;;  %v1155_v32 = vadd.f32 %v1153_v53, %v1149_v14 }
 0x2c5   : > { %v1446_v31 = vld [vmem:[%s2114_s21 + $0x28] sm:$0xff]  ;;  %v1111_v59 = vadd.f32 %v1109_v48, %v1107_v51  ;;  %v1127_v60 = vadd.f32 %v1440_v30, %v1123_v52  ;;  %v1152_v3 = vmul.f32 %v1151_v2, %v1096_v34 }
 0x2c6   : > { %v1108_v58 = vld [vmem:[%s2114_s21] sm:$0xff]  ;;  %v1439_v33 = vld [vmem:[%s2114_s21 + $0x10] sm:$0xff]  ;;  %v1143_v62 = vadd.f32 %v1446_v31, %v1139_v46  ;;  %v1138_v1 = vadd.f32 %v1136_v56, %v1132_v12 }
 0x2c7   : > { %v1110_v63 = vadd.f32 %v1108_v58, %v1106_v55  ;;  %v1126_v0 = vadd.f32 %v1439_v33, %v1122_v29  ;;  %v1452_v4 = vld [vmem:[%s2114_s21 + $0x38] sm:$0xff]  ;;  %1113 = vst.msk [vmem:[%s2114_s21 + $0x8] sm:$0xff] %vm634_vm1, %v1111_v59  ;;  %1442 = vst.msk [vmem:[%s2114_s21 + $0x18] sm:$0xff] %vm634_vm1, %v1127_v60  ;;  %v1445_v5 = vld [vmem:[%s2114_s21 + $0x20] sm:$0xff]  ;;  %v1154_v7 = vadd.f32 %v1152_v3, %v1148_v57 }
 0x2c8   : > { %1448 = vst.msk [vmem:[%s2114_s21 + $0x28] sm:$0xff] %vm634_vm1, %v1143_v62  ;;  %v1159_v6 = vadd.f32 %v1452_v4, %v1155_v32  ;;  %v1142_v36 = vadd.f32 %v1445_v5, %v1138_v1 }
 0x2c9   : > { %1112 = vst.msk [vmem:[%s2114_s21] sm:$0xff] %vm634_vm1, %v1110_v63  ;;  %1441 = vst.msk [vmem:[%s2114_s21 + $0x10] sm:$0xff] %vm634_vm1, %v1126_v0  ;;  %v1451_v54 = vld [vmem:[%s2114_s21 + $0x30] sm:$0xff] }
 0x2ca   : > { %1454 = vst.msk [vmem:[%s2114_s21 + $0x38] sm:$0xff] %vm634_vm1, %v1159_v6  ;;  %1447 = vst.msk [vmem:[%s2114_s21 + $0x20] sm:$0xff] %vm634_vm1, %v1142_v36  ;;  %v1158_v9 = vadd.f32 %v1451_v54, %v1154_v7 }
 0x2cc   : > { %1453 = vst.msk [vmem:[%s2114_s21 + $0x30] sm:$0xff] %vm634_vm1, %v1158_v9 }
 0x2cd   : > { %1701 = shalt.err (!%p1698_p5)
}
 0x2ce   : > { %s1702_s21 = scalar_lea.hbm %s2383_s15, 1024  ;;  %s1706_s23 = scalar_lea.hbm %s2445_s7, 2048 }
 0x2cf   : > { %p1703_p1 = scmp.ne.s32.totalorder %s2383_s15, %s1702_s21  ;;  %p1707_p12 = scmp.lt.u32.totalorder %s2383_s15, %s2445_s7 }
 0x2d0   : > { %p1708_p9 = scmp.lt.u32.totalorder %s1706_s23, %s1702_s21  ;;  %p1710_p7 = scmp.lt.u32.totalorder %s1702_s21, %s2383_s15 }
 0x2d1   : > { %p1704_p6 = pnand %p1703_p1, %p2476_p3 }
 0x2d2   : > { %p1709_p11 = por %p1708_p9, %p1707_p12 }
 0x2d3   : > { %p1705_p0 = pneg %p1704_p6 }
 0x2d4   : > { %p1711_p8 = por %p1710_p7, %p1709_p11 }
 0x2d6   : > { %p1712_p13 = pnand %p1711_p8, %p1705_p0 }
 0x2d8   : > { %1715 = shalt.err (!%p1712_p13)
}
 0x2d9   : > { %s1794_s18 = smov 128   ;;  %s1795_s22 = smov 8  }
 0x2da   : > { %1515 = dma.vmem_to_hbm [thread:$0]  (%p2476_p3), %s2385_s12, 1024, %s2383_s15, %s1163_s10, %s1794_s18, %s1794_s18, %s1795_s22  }
 0x2db PF: > { %s2477_s16 = sld [smem:[#allocation17_spill]]  ;;  %s1193_s20 = sand.u32 1, %s1762_s24  }
 0x2dc   : > { %p2478_p4 = scmp.ne.s32.totalorder %s2463_s14, 0  ;;  %s1194_s27 = scalar_lea.sflag [#allocation4], %s1193_s20 }
 0x2e1   : > { %p2479_p10 = scmp.ge.s32.totalorder %s2477_s16, 2 }
 0x2e3   : > { %p1532_p2 = pnand %p2479_p10, %p2478_p4 }
 0x2e5   : > { %1757 = dma.done.wait (!%p1532_p2), %s1194_s27, 1024  }
 0x2e6   : > { %1759 = vsyncadd (!%p1532_p2), %s1194_s27, 4294966272  ;;  %s28_s29 = sadd.s32 1, %s2477_s16   ;;  %s2480_s8 = sld [smem:[#allocation19_spill]] }
 0x2e7   : > { %p25_p5 = scmp.ge.s32.totalorder %s28_s29, 4   ;;  %s2481_s13 = sld [smem:[#allocation18_spill]] }
 0x2e8   : > { %s2482_s24 = smov %s1766_s25  ;;  %s2483_s25 = smov %s1770_s26 }
 0x2e9   : > { %s2485_s27 = smov %s1778_s28  ;;  %27 = sbr.rel (!%p25_p5) target bundleno = 14 (0xe), region = 127 }
 0x2ec   : > { %s2484_s26 = smov %s2480_s8 }
 0x2ed   : > { %s2486_s28 = smov %s2481_s13 }
 0x2f0   :  { %1199 = vsyncpa [#allocation3], 1 }
 0x2f1   :  { %1201 = vsyncpa [#allocation3 + $0x1], 1 }
 0x2f2   :  { %1202 = vsyncpa [#allocation7], 1 }
 0x2f3   :  { %1204 = vsyncpa [#allocation7 + $0x1], 1 }
 0x2f4   :  { %1205 = vsyncpa [#allocation4], 1 }
 0x2f5   :  { %1207 = vsyncpa [#allocation4 + $0x1], 1 }
 0x2f6   :  { %1208 = vsyncpa [#allocation5], 1 }
 0x2f7   :  { %1210 = vsyncpa [#allocation5 + $0x1], 1 }
 0x2f8   :  { %1211 = vsyncpa [#allocation10], 1 }

</bundles_post_ra>
